<compile_context>
chip_gen: v7x
topology: tpu7x:2x2x1
jax: 0.10.0
libtpu: 0.0.40
codegen_flags: <defaults>
</compile_context>

<pallas_src>
import functools

import jax
import jax.numpy as jnp
import numpy as np
from jax import lax
from jax.experimental import pallas as pl
from jax.experimental.pallas import tpu as pltpu


def _round_up(a, b):
    return (a + b - 1) // b * b


def _cdiv(a, b):
    return -(-a // b)


# ----------------------------------------------------------------------------
# Pallas kernel: one (tile_m, *) row-tile of the flattened (B*T_out) axis.
# BN scales are pre-folded into the bf16 weights; only shifts remain here.
# ----------------------------------------------------------------------------
def _melresnet_kernel(
    x_ref,      # (TM, KCp)            im2col'd input rows, bf16, lane-padded
    w_in_ref,   # (KCp, Cmid_p)        fused conv_in weight * bn0 scale, bf16
    bnh_ref,    # (1, Cmid_p)          folded BN0 shift (f32)
    rw1_ref,    # (R, Cmid_p, Cmid_p)  ResBlock conv1 weight * bn1 scale, bf16
    rh1_ref,    # (R, 1, Cmid_p)       ResBlock BN1 shift (f32)
    rw2_ref,    # (R, Cmid_p, Cmid_p)  ResBlock conv2 weight * bn2 scale, bf16
    rh2_ref,    # (R, 1, Cmid_p)       ResBlock BN2 shift (f32)
    wout_ref,   # (Cmid_p, Cout_p)     conv_out weight, bf16
    bout_ref,   # (1, Cout_p)          conv_out bias (f32)
    o_ref,      # (TM, Cout_p)         output rows (bf16), lane-dense
    h_ref,      # (TM, Cmid_p)         fp32 VMEM scratch accumulator
    *,
    num_res_blocks: int,
):
    # conv_in: k taps fused into one im2col matmul (contraction = k*Cin, padded).
    acc = jnp.dot(x_ref[...], w_in_ref[...], preferred_element_type=jnp.float32)
    # BN scale is folded into w_in; only shift + ReLU remain (fp32).
    h_ref[...] = jnp.maximum(acc + bnh_ref[...], 0.0)

    # Residual blocks: dynamic indexing of the stacked weights keeps only one
    # live copy of h (in the scratch ref) instead of R+1 SSA versions.
    # NOTE(v5e): the per-block h_ref store + the two bf16 casts are the likely
    # vst/VALU pressure points on v5e (single vst slot); audit the bundle dump
    # before adding a second bf16 copy of h.
    def res_block(i, carry):
        h = h_ref[...]
        y = jnp.dot(h.astype(jnp.bfloat16), rw1_ref[i],
                    preferred_element_type=jnp.float32)
        y = jnp.maximum(y + rh1_ref[i], 0.0)          # BN1 scale folded into rw1
        y = jnp.dot(y.astype(jnp.bfloat16), rw2_ref[i],
                    preferred_element_type=jnp.float32)
        h_ref[...] = h + y + rh2_ref[i]               # BN2 scale folded into rw2
        return carry

    lax.fori_loop(0, num_res_blocks, res_block, 0, unroll=True)

    # conv_out (1x1 conv with bias); lane-dense (Cout padded to 128) bf16 store.
    o_ref[...] = (
        jnp.dot(h_ref[...].astype(jnp.bfloat16), wout_ref[...],
                preferred_element_type=jnp.float32)
        + bout_ref[...]
    ).astype(o_ref.dtype)


# ----------------------------------------------------------------------------
# Wrapper: PyTorch-style (B, Cin, T) in, (B, Cout, T_out) out.
# ----------------------------------------------------------------------------
def melresnet_forward(x_bct, kparams, meta):
    B, Cin, T = x_bct.shape
    k = meta["k"]
    Cout = meta["cout"]
    KC = k * Cin
    KC_p = meta["kc_p"]
    Cmid_p = meta["cmid_p"]
    Cout_p = meta["cout_p"]
    R = meta["num_res_blocks"]
    T_out = T - k + 1

    # bf16 cast BEFORE the transpose so the transpose moves half the bytes.
    x_btc = jnp.transpose(x_bct.astype(jnp.bfloat16), (0, 2, 1))   # (B, T, Cin)

    # im2col: fuse conv_in's k shifted matmuls into one matmul contraction.
    cols = [x_btc[:, j:j + T_out, :] for j in range(k)]
    x_cols = jnp.concatenate(cols, axis=-1).reshape(B * T_out, KC)
    M_total = B * T_out

    # ---- VMEM budget (128 MiB on v5e/v6e, 64 MiB on v7x) --------------------
    try:
        phys_vmem = int(pltpu.get_tpu_info().vmem_capacity_bytes)
    except Exception:
        phys_vmem = 64 * 1024 * 1024          # conservative default (v7x size)
    vmem_ceiling = max(phys_vmem - 8 * 1024 * 1024, 16 * 1024 * 1024)

    weight_bytes = ((KC_p * Cmid_p + 2 * R * Cmid_p * Cmid_p + Cmid_p * Cout_p) * 2
                    + ((1 + 2 * R) * Cmid_p + Cout_p) * 4)
    # per-row VMEM: bf16 x tile (x2 buffers) + bf16 out tile (x2) + f32 scratch.
    per_row_bytes = KC_p * 2 * 2 + Cout_p * 2 * 2 + Cmid_p * 4

    # ---- row-tile selection (16-row / bf16-sublane granularity) -------------
    tile_budget = max(vmem_ceiling - 2 * weight_bytes - (4 << 20), 1 << 20)
    tile_cap = max(tile_budget // per_row_bytes, 16)
    tile_m = min(1024, tile_cap, _round_up(M_total, 16))
    if tile_m >= 256:
        tile_m = (tile_m // 256) * 256        # big tiles: multiple of 256
    else:
        tile_m = max((tile_m // 16) * 16, 16)
    # Guarantee >= 2 grid steps whenever there is more than one 16-row slab so
    # the "parallel" axis shards across both v7x TensorCores.
    if M_total > 16 and _round_up(M_total, tile_m) // tile_m < 2:
        tile_m = _round_up(_cdiv(_round_up(M_total, 16), 2), 16)
    M_pad = _round_up(M_total, tile_m)
    grid_m = M_pad // tile_m

    x_cols = jnp.pad(x_cols, ((0, M_pad - M_total), (0, KC_p - KC)))

    kernel = functools.partial(_melresnet_kernel, num_res_blocks=R)

    # Advisory cost estimate for XLA scheduling of the surrounding transposes.
    matmul_k = KC_p * Cmid_p + 2 * R * Cmid_p * Cmid_p + Cmid_p * Cout_p
    flops = 2 * M_pad * matmul_k
    bytes_accessed = M_pad * KC_p * 2 + weight_bytes + M_pad * Cout_p * 2

    vmem_limit = int(min(vmem_ceiling,
                         max(2 * weight_bytes + tile_m * per_row_bytes + (4 << 20),
                             32 * 1024 * 1024)))

    def build_call(single_buffer_weights):
        # Weights / BN shifts have constant index maps; single-buffer them so
        # they don't pay double VMEM (most valuable on v7x's 64 MiB VMEM).
        w_kw = ({"pipeline_mode": pl.Buffered(1)} if single_buffer_weights else {})
        in_specs = [
            pl.BlockSpec((tile_m, KC_p), lambda m: (m, 0)),                  # x rows
            pl.BlockSpec((KC_p, Cmid_p), lambda m: (0, 0), **w_kw),          # w_in
            pl.BlockSpec((1, Cmid_p), lambda m: (0, 0), **w_kw),             # bn0 shift
            pl.BlockSpec((R, Cmid_p, Cmid_p), lambda m: (0, 0, 0), **w_kw),  # res w1
            pl.BlockSpec((R, 1, Cmid_p), lambda m: (0, 0, 0), **w_kw),       # res shift1
            pl.BlockSpec((R, Cmid_p, Cmid_p), lambda m: (0, 0, 0), **w_kw),  # res w2
            pl.BlockSpec((R, 1, Cmid_p), lambda m: (0, 0, 0), **w_kw),       # res shift2
            pl.BlockSpec((Cmid_p, Cout_p), lambda m: (0, 0), **w_kw),        # w_out
            pl.BlockSpec((1, Cout_p), lambda m: (0, 0), **w_kw),             # b_out
        ]
        return pl.pallas_call(
            kernel,
            out_shape=jax.ShapeDtypeStruct((M_pad, Cout_p), jnp.bfloat16),
            grid=(grid_m,),
            in_specs=in_specs,
            out_specs=pl.BlockSpec((tile_m, Cout_p), lambda m: (m, 0)),
            scratch_shapes=[pltpu.VMEM((tile_m, Cmid_p), jnp.float32)],
            compiler_params=pltpu.CompilerParams(
                dimension_semantics=("parallel",),
                vmem_limit_bytes=vmem_limit,
            ),
            cost_estimate=pl.CostEstimate(
                flops=flops, transcendentals=0, bytes_accessed=bytes_accessed),
        )

    args = (x_cols,
            kparams["w_in"], kparams["bn_shift"],
            kparams["res_w1"], kparams["res_h1"],
            kparams["res_w2"], kparams["res_h2"],
            kparams["w_out"], kparams["b_out"])
    try:
        out = build_call(True)(*args)
    except Exception:
        # Fallback if this JAX build rejects Buffered(1) weight specs; default
        # double-buffering only costs extra weight VMEM, semantics identical.
        out = build_call(False)(*args)

    # Drop row/lane padding, restore (B, T_out, Cout); transpose in bf16
    # (half the bytes), then upcast to f32 for the PyTorch-like interface.
    out = out[:M_total, :Cout].reshape(B, T_out, Cout)
    return jnp.transpose(out, (0, 2, 1)).astype(jnp.float32)


# ----------------------------------------------------------------------------
# Deterministic PyTorch-layout parameter construction + packing for the kernel.
# ----------------------------------------------------------------------------
def _rand_bn(key, dims):
    k1, k2, k3, k4 = jax.random.split(key, 4)
    gamma = 1.0 + 0.1 * jax.random.normal(k1, (dims,), jnp.float32)
    beta = 0.1 * jax.random.normal(k2, (dims,), jnp.float32)
    mean = 0.1 * jax.random.normal(k3, (dims,), jnp.float32)
    var = jnp.abs(jax.random.normal(k4, (dims,), jnp.float32)) + 0.5
    return (gamma, beta, mean, var)


def make_raw_params(key, num_res_blocks, in_dims, compute_dims, res_out_dims, pad):
    k_size = 2 * pad + 1
    keys = jax.random.split(key, 4 + num_res_blocks)
    w_in = 0.1 * jax.random.normal(keys[0], (compute_dims, in_dims, k_size), jnp.float32)
    bn0 = _rand_bn(keys[1], compute_dims)
    res = []
    for i in range(num_res_blocks):
        kk = jax.random.split(keys[2 + i], 4)
        w1 = 0.1 * jax.random.normal(kk[0], (compute_dims, compute_dims), jnp.float32)
        w2 = 0.1 * jax.random.normal(kk[1], (compute_dims, compute_dims), jnp.float32)
        res.append((w1, _rand_bn(kk[2], compute_dims), w2, _rand_bn(kk[3], compute_dims)))
    w_out = 0.1 * jax.random.normal(
        keys[2 + num_res_blocks], (res_out_dims, compute_dims), jnp.float32)
    b_out = 0.1 * jax.random.normal(keys[3 + num_res_blocks], (res_out_dims,), jnp.float32)
    return {"w_in": w_in, "bn0": bn0, "res": res, "w_out": w_out, "b_out": b_out}


def pack_params(raw, eps=1e-5):
    """Fold eval-mode BN scales into the conv weights; keep only shifts."""
    w_in = np.asarray(raw["w_in"])              # (Cmid, Cin, k)
    Cmid, Cin, k = w_in.shape
    Cout = int(raw["w_out"].shape[0])
    R = len(raw["res"])
    KC = k * Cin
    KC_p = _round_up(KC, 128)
    Cmid_p = _round_up(Cmid, 128)
    Cout_p = _round_up(Cout, 128)

    def fold(bn):
        g, b, m, v = [np.asarray(t, np.float32) for t in bn]
        s = g / np.sqrt(v + eps)
        t = b - m * s
        return s, t

    s0, t0 = fold(raw["bn0"])

    # conv_in as a single (k*Cin, Cmid) matrix (tap-major rows), zero-padded,
    # with the first BN's scale folded into the output columns (fp32 fold,
    # then one bf16 cast).
    w_in_mat = np.zeros((KC_p, Cmid_p), np.float32)
    for j in range(k):
        w_in_mat[j * Cin:(j + 1) * Cin, :Cmid] = w_in[:, :, j].T * s0[None, :]
    bnh = np.zeros((1, Cmid_p), np.float32)
    bnh[0, :Cmid] = t0

    rw1 = np.zeros((max(R, 1), Cmid_p, Cmid_p), np.float32)
    rw2 = np.zeros_like(rw1)
    rh1 = np.zeros((max(R, 1), 1, Cmid_p), np.float32)
    rh2 = np.zeros_like(rh1)
    for i, (w1, bn1, w2, bn2) in enumerate(raw["res"]):
        s1, t1 = fold(bn1)
        s2, t2 = fold(bn2)
        rw1[i, :Cmid, :Cmid] = np.asarray(w1).T * s1[None, :]
        rw2[i, :Cmid, :Cmid] = np.asarray(w2).T * s2[None, :]
        rh1[i, 0, :Cmid] = t1
        rh2[i, 0, :Cmid] = t2

    w_out = np.zeros((Cmid_p, Cout_p), np.float32)
    w_out[:Cmid, :Cout] = np.asarray(raw["w_out"]).T
    b_out = np.zeros((1, Cout_p), np.float32)
    b_out[0, :Cout] = np.asarray(raw["b_out"])

    kparams = {
        "w_in": jnp.asarray(w_in_mat, jnp.bfloat16),
        "bn_shift": jnp.asarray(bnh),
        "res_w1": jnp.asarray(rw1, jnp.bfloat16),
        "res_h1": jnp.asarray(rh1),
        "res_w2": jnp.asarray(rw2, jnp.bfloat16),
        "res_h2": jnp.asarray(rh2),
        "w_out": jnp.asarray(w_out, jnp.bfloat16),
        "b_out": jnp.asarray(b_out),
    }
    meta = dict(k=k, cin=Cin, cmid=Cmid, cout=Cout,
                kc_p=KC_p, cmid_p=Cmid_p, cout_p=Cout_p, num_res_blocks=R)
    return kparams, meta


# ----------------------------------------------------------------------------
# Pure-JAX fp32 reference (PyTorch NCW semantics, eval-mode BatchNorm).
# ----------------------------------------------------------------------------
def reference_forward(x_bct, raw, eps=1e-5):
    hp = jax.lax.Precision.HIGHEST
    x = x_bct.astype(jnp.float32)
    w_in = raw["w_in"]                           # (Cmid, Cin, k)
    k = w_in.shape[2]
    T_out = x.shape[2] - k + 1

    def bn(z, params):
        g, b, m, v = params
        return ((z - m[None, :, None]) / jnp.sqrt(v[None, :, None] + eps)
                * g[None, :, None] + b[None, :, None])

    y = jnp.zeros((x.shape[0], w_in.shape[0], T_out), jnp.float32)
    for j in range(k):
        y = y + jnp.einsum("oc,bct->bot", w_in[:, :, j], x[:, :, j:j + T_out],
                           precision=hp)
    y = jax.nn.relu(bn(y, raw["bn0"]))

    for (w1, bn1, w2, bn2) in raw["res"]:
        h = jnp.einsum("oc,bct->bot", w1, y, precision=hp)
        h = jax.nn.relu(bn(h, bn1))
        h = jnp.einsum("oc,bct->bot", w2, h, precision=hp)
        h = bn(h, bn2)
        y = y + h

    out = jnp.einsum("oc,bct->bot", raw["w_out"], y, precision=hp)
    return out + raw["b_out"][None, :, None]


if __name__ == "__main__":
    # Small, module-consistent shapes.
    # NOTE: at these toy sizes (Cmid=32 padded to 128) the kernel is
    # padding/overhead-bound; real deployments should use compute_dims (and
    # ideally k*in_dims) as multiples of 128 before tuning further.
    num_res_blocks = 3
    in_dims = 16        # number of mel channels
    compute_dims = 32
    res_out_dims = 16
    pad = 2             # -> conv_in kernel size 5
    B, T = 2, 24        # output length = T - 2*pad = 20

    key = jax.random.PRNGKey(0)
    kx, kp = jax.random.split(key)
    x = jax.random.normal(kx, (B, in_dims, T), jnp.float32)      # PyTorch NCW
    raw = make_raw_params(kp, num_res_blocks, in_dims, compute_dims,
                          res_out_dims, pad)
    kparams, meta = pack_params(raw)

    out = jax.block_until_ready(melresnet_forward(x, kparams, meta))
    ref = jax.block_until_ready(reference_forward(x, raw))

    assert out.shape == (B, res_out_dims, T - 2 * pad), out.shape
    # Kernel matmuls take bf16 inputs with fp32 accumulation and the output is
    # stored in bf16; reference is full fp32 (HIGHEST), so ~4e-2 tolerance is
    # expected and documented.
    np.testing.assert_allclose(np.asarray(out), np.asarray(ref),
                               rtol=4e-2, atol=4e-2)
    print("KERNEL_OK")
</pallas_src>

<mosaic_0001>
module attributes {stable_mosaic.version = 11 : i64} {
  func.func @_melresnet_kernel(%arg0: i32, %arg1: memref<32x128xbf16, #tpu.memory_space<vmem>>, %arg2: memref<128x128xbf16, #tpu.memory_space<vmem>>, %arg3: memref<1x128xf32, #tpu.memory_space<vmem>>, %arg4: memref<3x128x128xbf16, #tpu.memory_space<vmem>>, %arg5: memref<3x1x128xf32, #tpu.memory_space<vmem>>, %arg6: memref<3x128x128xbf16, #tpu.memory_space<vmem>>, %arg7: memref<3x1x128xf32, #tpu.memory_space<vmem>>, %arg8: memref<128x128xbf16, #tpu.memory_space<vmem>>, %arg9: memref<1x128xf32, #tpu.memory_space<vmem>>, %arg10: memref<32x128xbf16, #tpu.memory_space<vmem>>, %arg11: memref<32x128xf32, #tpu.memory_space<vmem>>) attributes {dimension_semantics = [#tpu.dimension_semantics<parallel>], iteration_bounds = array<i64: 2>, scalar_prefetch = 0 : i64, scratch_operands = 1 : i64, tpu.core_type = #tpu.core_type<tc>, window_params = [{transform_indices = @transform_0, window_bounds = array<i64: 32, 128>}, {pipeline_mode = #tpu.pipeline_mode<synchronous>, transform_indices = @transform_1, window_bounds = array<i64: 128, 128>}, {pipeline_mode = #tpu.pipeline_mode<synchronous>, transform_indices = @transform_2, window_bounds = array<i64: 1, 128>}, {pipeline_mode = #tpu.pipeline_mode<synchronous>, transform_indices = @transform_3, window_bounds = array<i64: 3, 128, 128>}, {pipeline_mode = #tpu.pipeline_mode<synchronous>, transform_indices = @transform_4, window_bounds = array<i64: 3, 1, 128>}, {pipeline_mode = #tpu.pipeline_mode<synchronous>, transform_indices = @transform_5, window_bounds = array<i64: 3, 128, 128>}, {pipeline_mode = #tpu.pipeline_mode<synchronous>, transform_indices = @transform_6, window_bounds = array<i64: 3, 1, 128>}, {pipeline_mode = #tpu.pipeline_mode<synchronous>, transform_indices = @transform_7, window_bounds = array<i64: 128, 128>}, {pipeline_mode = #tpu.pipeline_mode<synchronous>, transform_indices = @transform_8, window_bounds = array<i64: 1, 128>}, {transform_indices = @transform_9, window_bounds = array<i64: 32, 128>}]} {
    %c0 = arith.constant 0 : index
    %c0_0 = arith.constant 0 : index
    %0 = vector.load %arg1[%c0, %c0_0] : memref<32x128xbf16, #tpu.memory_space<vmem>>, vector<32x128xbf16>
    %c0_1 = arith.constant 0 : index
    %c0_2 = arith.constant 0 : index
    %1 = vector.load %arg2[%c0_1, %c0_2] : memref<128x128xbf16, #tpu.memory_space<vmem>>, vector<128x128xbf16>
    %cst = arith.constant dense<0.000000e+00> : vector<32x128xf32>
    %2 = tpu.matmul %0, %1, %cst {dimension_numbers = #tpu.dot_dimension_numbers<[1], [0], [0], [1], [0, 0, 1, 1], [], []>} : vector<32x128xbf16>, vector<128x128xbf16>, vector<32x128xf32> -> vector<32x128xf32>
    %c0_3 = arith.constant 0 : index
    %c0_4 = arith.constant 0 : index
    %3 = vector.load %arg3[%c0_3, %c0_4] : memref<1x128xf32, #tpu.memory_space<vmem>>, vector<1x128xf32>
    %4 = vector.broadcast %3 : vector<1x128xf32> to vector<32x128xf32>
    %5 = arith.addf %2, %4 : vector<32x128xf32>
    %cst_5 = arith.constant 0.000000e+00 : f32
    %6 = vector.broadcast %cst_5 : f32 to vector<32x128xf32>
    %7 = arith.maximumf %5, %6 : vector<32x128xf32>
    %c0_6 = arith.constant 0 : index
    %c0_7 = arith.constant 0 : index
    %8 = vector.load %arg11[%c0_6, %c0_7] : memref<32x128xf32, #tpu.memory_space<vmem>>, vector<32x128xf32>
    tpu.vector_store %arg11[%c0_6, %c0_7], %7 {strides = array<i32>} : memref<32x128xf32, #tpu.memory_space<vmem>>, vector<32x128xf32>,
    %c0_i32 = arith.constant 0 : i32
    %c0_8 = arith.constant 0 : index
    %c0_9 = arith.constant 0 : index
    %9 = vector.load %arg11[%c0_8, %c0_9] : memref<32x128xf32, #tpu.memory_space<vmem>>, vector<32x128xf32>
    %10 = arith.truncf %9 : vector<32x128xf32> to vector<32x128xbf16>
    %11 = arith.index_cast %c0_i32 : i32 to index
    %c0_10 = arith.constant 0 : index
    %c0_11 = arith.constant 0 : index
    %12 = vector.load %arg4[%11, %c0_10, %c0_11] : memref<3x128x128xbf16, #tpu.memory_space<vmem>>, vector<1x128x128xbf16>
    %13 = vector.shape_cast %12 : vector<1x128x128xbf16> to vector<128x128xbf16>
    %cst_12 = arith.constant dense<0.000000e+00> : vector<32x128xf32>
    %14 = tpu.matmul %10, %13, %cst_12 {dimension_numbers = #tpu.dot_dimension_numbers<[1], [0], [0], [1], [0, 0, 1, 1], [], []>} : vector<32x128xbf16>, vector<128x128xbf16>, vector<32x128xf32> -> vector<32x128xf32>
    %15 = arith.index_cast %c0_i32 : i32 to index
    %c0_13 = arith.constant 0 : index
    %c0_14 = arith.constant 0 : index
    %16 = vector.load %arg5[%15, %c0_13, %c0_14] : memref<3x1x128xf32, #tpu.memory_space<vmem>>, vector<1x1x128xf32>
    %17 = vector.shape_cast %16 : vector<1x1x128xf32> to vector<1x128xf32>
    %18 = vector.broadcast %17 : vector<1x128xf32> to vector<32x128xf32>
    %19 = arith.addf %14, %18 : vector<32x128xf32>
    %cst_15 = arith.constant 0.000000e+00 : f32
    %20 = vector.broadcast %cst_15 : f32 to vector<32x128xf32>
    %21 = arith.maximumf %19, %20 : vector<32x128xf32>
    %22 = arith.truncf %21 : vector<32x128xf32> to vector<32x128xbf16>
    %23 = arith.index_cast %c0_i32 : i32 to index
    %c0_16 = arith.constant 0 : index
    %c0_17 = arith.constant 0 : index
    %24 = vector.load %arg6[%23, %c0_16, %c0_17] : memref<3x128x128xbf16, #tpu.memory_space<vmem>>, vector<1x128x128xbf16>
    %25 = vector.shape_cast %24 : vector<1x128x128xbf16> to vector<128x128xbf16>
    %cst_18 = arith.constant dense<0.000000e+00> : vector<32x128xf32>
    %26 = tpu.matmul %22, %25, %cst_18 {dimension_numbers = #tpu.dot_dimension_numbers<[1], [0], [0], [1], [0, 0, 1, 1], [], []>} : vector<32x128xbf16>, vector<128x128xbf16>, vector<32x128xf32> -> vector<32x128xf32>
    %27 = arith.addf %9, %26 : vector<32x128xf32>
    %28 = arith.index_cast %c0_i32 : i32 to index
    %c0_19 = arith.constant 0 : index
    %c0_20 = arith.constant 0 : index
    %29 = vector.load %arg7[%28, %c0_19, %c0_20] : memref<3x1x128xf32, #tpu.memory_space<vmem>>, vector<1x1x128xf32>
    %30 = vector.shape_cast %29 : vector<1x1x128xf32> to vector<1x128xf32>
    %31 = vector.broadcast %30 : vector<1x128xf32> to vector<32x128xf32>
    %32 = arith.addf %27, %31 : vector<32x128xf32>
    %c0_21 = arith.constant 0 : index
    %c0_22 = arith.constant 0 : index
    %33 = vector.load %arg11[%c0_21, %c0_22] : memref<32x128xf32, #tpu.memory_space<vmem>>, vector<32x128xf32>
    tpu.vector_store %arg11[%c0_21, %c0_22], %32 {strides = array<i32>} : memref<32x128xf32, #tpu.memory_space<vmem>>, vector<32x128xf32>,
    %c1_i32 = arith.constant 1 : i32
    %c0_23 = arith.constant 0 : index
    %c0_24 = arith.constant 0 : index
    %34 = vector.load %arg11[%c0_23, %c0_24] : memref<32x128xf32, #tpu.memory_space<vmem>>, vector<32x128xf32>
    %35 = arith.truncf %34 : vector<32x128xf32> to vector<32x128xbf16>
    %36 = arith.index_cast %c1_i32 : i32 to index
    %c0_25 = arith.constant 0 : index
    %c0_26 = arith.constant 0 : index
    %37 = vector.load %arg4[%36, %c0_25, %c0_26] : memref<3x128x128xbf16, #tpu.memory_space<vmem>>, vector<1x128x128xbf16>
    %38 = vector.shape_cast %37 : vector<1x128x128xbf16> to vector<128x128xbf16>
    %cst_27 = arith.constant dense<0.000000e+00> : vector<32x128xf32>
    %39 = tpu.matmul %35, %38, %cst_27 {dimension_numbers = #tpu.dot_dimension_numbers<[1], [0], [0], [1], [0, 0, 1, 1], [], []>} : vector<32x128xbf16>, vector<128x128xbf16>, vector<32x128xf32> -> vector<32x128xf32>
    %40 = arith.index_cast %c1_i32 : i32 to index
    %c0_28 = arith.constant 0 : index
    %c0_29 = arith.constant 0 : index
    %41 = vector.load %arg5[%40, %c0_28, %c0_29] : memref<3x1x128xf32, #tpu.memory_space<vmem>>, vector<1x1x128xf32>
    %42 = vector.shape_cast %41 : vector<1x1x128xf32> to vector<1x128xf32>
    %43 = vector.broadcast %42 : vector<1x128xf32> to vector<32x128xf32>
    %44 = arith.addf %39, %43 : vector<32x128xf32>
    %cst_30 = arith.constant 0.000000e+00 : f32
    %45 = vector.broadcast %cst_30 : f32 to vector<32x128xf32>
    %46 = arith.maximumf %44, %45 : vector<32x128xf32>
    %47 = arith.truncf %46 : vector<32x128xf32> to vector<32x128xbf16>
    %48 = arith.index_cast %c1_i32 : i32 to index
    %c0_31 = arith.constant 0 : index
    %c0_32 = arith.constant 0 : index
    %49 = vector.load %arg6[%48, %c0_31, %c0_32] : memref<3x128x128xbf16, #tpu.memory_space<vmem>>, vector<1x128x128xbf16>
    %50 = vector.shape_cast %49 : vector<1x128x128xbf16> to vector<128x128xbf16>
    %cst_33 = arith.constant dense<0.000000e+00> : vector<32x128xf32>
    %51 = tpu.matmul %47, %50, %cst_33 {dimension_numbers = #tpu.dot_dimension_numbers<[1], [0], [0], [1], [0, 0, 1, 1], [], []>} : vector<32x128xbf16>, vector<128x128xbf16>, vector<32x128xf32> -> vector<32x128xf32>
    %52 = arith.addf %34, %51 : vector<32x128xf32>
    %53 = arith.index_cast %c1_i32 : i32 to index
    %c0_34 = arith.constant 0 : index
    %c0_35 = arith.constant 0 : index
    %54 = vector.load %arg7[%53, %c0_34, %c0_35] : memref<3x1x128xf32, #tpu.memory_space<vmem>>, vector<1x1x128xf32>
    %55 = vector.shape_cast %54 : vector<1x1x128xf32> to vector<1x128xf32>
    %56 = vector.broadcast %55 : vector<1x128xf32> to vector<32x128xf32>
    %57 = arith.addf %52, %56 : vector<32x128xf32>
    %c0_36 = arith.constant 0 : index
    %c0_37 = arith.constant 0 : index
    %58 = vector.load %arg11[%c0_36, %c0_37] : memref<32x128xf32, #tpu.memory_space<vmem>>, vector<32x128xf32>
    tpu.vector_store %arg11[%c0_36, %c0_37], %57 {strides = array<i32>} : memref<32x128xf32, #tpu.memory_space<vmem>>, vector<32x128xf32>,
    %c2_i32 = arith.constant 2 : i32
    %c0_38 = arith.constant 0 : index
    %c0_39 = arith.constant 0 : index
    %59 = vector.load %arg11[%c0_38, %c0_39] : memref<32x128xf32, #tpu.memory_space<vmem>>, vector<32x128xf32>
    %60 = arith.truncf %59 : vector<32x128xf32> to vector<32x128xbf16>
    %61 = arith.index_cast %c2_i32 : i32 to index
    %c0_40 = arith.constant 0 : index
    %c0_41 = arith.constant 0 : index
    %62 = vector.load %arg4[%61, %c0_40, %c0_41] : memref<3x128x128xbf16, #tpu.memory_space<vmem>>, vector<1x128x128xbf16>
    %63 = vector.shape_cast %62 : vector<1x128x128xbf16> to vector<128x128xbf16>
    %cst_42 = arith.constant dense<0.000000e+00> : vector<32x128xf32>
    %64 = tpu.matmul %60, %63, %cst_42 {dimension_numbers = #tpu.dot_dimension_numbers<[1], [0], [0], [1], [0, 0, 1, 1], [], []>} : vector<32x128xbf16>, vector<128x128xbf16>, vector<32x128xf32> -> vector<32x128xf32>
    %65 = arith.index_cast %c2_i32 : i32 to index
    %c0_43 = arith.constant 0 : index
    %c0_44 = arith.constant 0 : index
    %66 = vector.load %arg5[%65, %c0_43, %c0_44] : memref<3x1x128xf32, #tpu.memory_space<vmem>>, vector<1x1x128xf32>
    %67 = vector.shape_cast %66 : vector<1x1x128xf32> to vector<1x128xf32>
    %68 = vector.broadcast %67 : vector<1x128xf32> to vector<32x128xf32>
    %69 = arith.addf %64, %68 : vector<32x128xf32>
    %cst_45 = arith.constant 0.000000e+00 : f32
    %70 = vector.broadcast %cst_45 : f32 to vector<32x128xf32>
    %71 = arith.maximumf %69, %70 : vector<32x128xf32>
    %72 = arith.truncf %71 : vector<32x128xf32> to vector<32x128xbf16>
    %73 = arith.index_cast %c2_i32 : i32 to index
    %c0_46 = arith.constant 0 : index
    %c0_47 = arith.constant 0 : index
    %74 = vector.load %arg6[%73, %c0_46, %c0_47] : memref<3x128x128xbf16, #tpu.memory_space<vmem>>, vector<1x128x128xbf16>
    %75 = vector.shape_cast %74 : vector<1x128x128xbf16> to vector<128x128xbf16>
    %cst_48 = arith.constant dense<0.000000e+00> : vector<32x128xf32>
    %76 = tpu.matmul %72, %75, %cst_48 {dimension_numbers = #tpu.dot_dimension_numbers<[1], [0], [0], [1], [0, 0, 1, 1], [], []>} : vector<32x128xbf16>, vector<128x128xbf16>, vector<32x128xf32> -> vector<32x128xf32>
    %77 = arith.addf %59, %76 : vector<32x128xf32>
    %78 = arith.index_cast %c2_i32 : i32 to index
    %c0_49 = arith.constant 0 : index
    %c0_50 = arith.constant 0 : index
    %79 = vector.load %arg7[%78, %c0_49, %c0_50] : memref<3x1x128xf32, #tpu.memory_space<vmem>>, vector<1x1x128xf32>
    %80 = vector.shape_cast %79 : vector<1x1x128xf32> to vector<1x128xf32>
    %81 = vector.broadcast %80 : vector<1x128xf32> to vector<32x128xf32>
    %82 = arith.addf %77, %81 : vector<32x128xf32>
    %c0_51 = arith.constant 0 : index
    %c0_52 = arith.constant 0 : index
    %83 = vector.load %arg11[%c0_51, %c0_52] : memref<32x128xf32, #tpu.memory_space<vmem>>, vector<32x128xf32>
    tpu.vector_store %arg11[%c0_51, %c0_52], %82 {strides = array<i32>} : memref<32x128xf32, #tpu.memory_space<vmem>>, vector<32x128xf32>,
    %c3_i32 = arith.constant 3 : i32
    %c0_53 = arith.constant 0 : index
    %c0_54 = arith.constant 0 : index
    %84 = vector.load %arg11[%c0_53, %c0_54] : memref<32x128xf32, #tpu.memory_space<vmem>>, vector<32x128xf32>
    %85 = arith.truncf %84 : vector<32x128xf32> to vector<32x128xbf16>
    %c0_55 = arith.constant 0 : index
    %c0_56 = arith.constant 0 : index
    %86 = vector.load %arg8[%c0_55, %c0_56] : memref<128x128xbf16, #tpu.memory_space<vmem>>, vector<128x128xbf16>
    %cst_57 = arith.constant dense<0.000000e+00> : vector<32x128xf32>
    %87 = tpu.matmul %85, %86, %cst_57 {dimension_numbers = #tpu.dot_dimension_numbers<[1], [0], [0], [1], [0, 0, 1, 1], [], []>} : vector<32x128xbf16>, vector<128x128xbf16>, vector<32x128xf32> -> vector<32x128xf32>
    %c0_58 = arith.constant 0 : index
    %c0_59 = arith.constant 0 : index
    %88 = vector.load %arg9[%c0_58, %c0_59] : memref<1x128xf32, #tpu.memory_space<vmem>>, vector<1x128xf32>
    %89 = vector.broadcast %88 : vector<1x128xf32> to vector<32x128xf32>
    %90 = arith.addf %87, %89 : vector<32x128xf32>
    %91 = arith.truncf %90 : vector<32x128xf32> to vector<32x128xbf16>
    %c0_60 = arith.constant 0 : index
    %c0_61 = arith.constant 0 : index
    %92 = vector.load %arg10[%c0_60, %c0_61] : memref<32x128xbf16, #tpu.memory_space<vmem>>, vector<32x128xbf16>
    tpu.vector_store %arg10[%c0_60, %c0_61], %91 {strides = array<i32>} : memref<32x128xbf16, #tpu.memory_space<vmem>>, vector<32x128xbf16>,
    return
  }
  func.func @transform_0(%arg0: i32) -> (i32, i32) {
    %c0_i32 = arith.constant 0 : i32
    %c0_i32_0 = arith.constant 0 : i32
    return %arg0, %c0_i32 : i32, i32
  }
  func.func @transform_1(%arg0: i32) -> (i32, i32) {
    %c0_i32 = arith.constant 0 : i32
    %c0_i32_0 = arith.constant 0 : i32
    %c0_i32_1 = arith.constant 0 : i32
    return %c0_i32, %c0_i32_0 : i32, i32
  }
  func.func @transform_2(%arg0: i32) -> (i32, i32) {
    %c0_i32 = arith.constant 0 : i32
    %c0_i32_0 = arith.constant 0 : i32
    %c0_i32_1 = arith.constant 0 : i32
    return %c0_i32, %c0_i32_0 : i32, i32
  }
  func.func @transform_3(%arg0: i32) -> (i32, i32, i32) {
    %c0_i32 = arith.constant 0 : i32
    %c0_i32_0 = arith.constant 0 : i32
    %c0_i32_1 = arith.constant 0 : i32
    %c0_i32_2 = arith.constant 0 : i32
    return %c0_i32, %c0_i32_0, %c0_i32_1 : i32, i32, i32
  }
  func.func @transform_4(%arg0: i32) -> (i32, i32, i32) {
    %c0_i32 = arith.constant 0 : i32
    %c0_i32_0 = arith.constant 0 : i32
    %c0_i32_1 = arith.constant 0 : i32
    %c0_i32_2 = arith.constant 0 : i32
    return %c0_i32, %c0_i32_0, %c0_i32_1 : i32, i32, i32
  }
  func.func @transform_5(%arg0: i32) -> (i32, i32, i32) {
    %c0_i32 = arith.constant 0 : i32
    %c0_i32_0 = arith.constant 0 : i32
    %c0_i32_1 = arith.constant 0 : i32
    %c0_i32_2 = arith.constant 0 : i32
    return %c0_i32, %c0_i32_0, %c0_i32_1 : i32, i32, i32
  }
  func.func @transform_6(%arg0: i32) -> (i32, i32, i32) {
    %c0_i32 = arith.constant 0 : i32
    %c0_i32_0 = arith.constant 0 : i32
    %c0_i32_1 = arith.constant 0 : i32
    %c0_i32_2 = arith.constant 0 : i32
    return %c0_i32, %c0_i32_0, %c0_i32_1 : i32, i32, i32
  }
  func.func @transform_7(%arg0: i32) -> (i32, i32) {
    %c0_i32 = arith.constant 0 : i32
    %c0_i32_0 = arith.constant 0 : i32
    %c0_i32_1 = arith.constant 0 : i32
    return %c0_i32, %c0_i32_0 : i32, i32
  }
  func.func @transform_8(%arg0: i32) -> (i32, i32) {
    %c0_i32 = arith.constant 0 : i32
    %c0_i32_0 = arith.constant 0 : i32
    %c0_i32_1 = arith.constant 0 : i32
    return %c0_i32, %c0_i32_0 : i32, i32
  }
  func.func @transform_9(%arg0: i32) -> (i32, i32) {
    %c0_i32 = arith.constant 0 : i32
    %c0_i32_0 = arith.constant 0 : i32
    return %arg0, %c0_i32 : i32, i32
  }
}

module attributes {stable_mosaic.version = 11 : i64} {
  func.func @_melresnet_kernel(%arg0: i32, %arg1: memref<32x128xbf16, #tpu.memory_space<vmem>>, %arg2: memref<128x128xbf16, #tpu.memory_space<vmem>>, %arg3: memref<1x128xf32, #tpu.memory_space<vmem>>, %arg4: memref<3x128x128xbf16, #tpu.memory_space<vmem>>, %arg5: memref<3x1x128xf32, #tpu.memory_space<vmem>>, %arg6: memref<3x128x128xbf16, #tpu.memory_space<vmem>>, %arg7: memref<3x1x128xf32, #tpu.memory_space<vmem>>, %arg8: memref<128x128xbf16, #tpu.memory_space<vmem>>, %arg9: memref<1x128xf32, #tpu.memory_space<vmem>>, %arg10: memref<32x128xbf16, #tpu.memory_space<vmem>>, %arg11: memref<32x128xf32, #tpu.memory_space<vmem>>) attributes {dimension_semantics = [#tpu.dimension_semantics<parallel>], iteration_bounds = array<i64: 2>, scalar_prefetch = 0 : i64, scratch_operands = 1 : i64, tpu.core_type = #tpu.core_type<tc>, window_params = [{transform_indices = @transform_0, window_bounds = array<i64: 32, 128>}, {pipeline_mode = #tpu.pipeline_mode<synchronous>, transform_indices = @transform_1, window_bounds = array<i64: 128, 128>}, {pipeline_mode = #tpu.pipeline_mode<synchronous>, transform_indices = @transform_2, window_bounds = array<i64: 1, 128>}, {pipeline_mode = #tpu.pipeline_mode<synchronous>, transform_indices = @transform_3, window_bounds = array<i64: 3, 128, 128>}, {pipeline_mode = #tpu.pipeline_mode<synchronous>, transform_indices = @transform_4, window_bounds = array<i64: 3, 1, 128>}, {pipeline_mode = #tpu.pipeline_mode<synchronous>, transform_indices = @transform_5, window_bounds = array<i64: 3, 128, 128>}, {pipeline_mode = #tpu.pipeline_mode<synchronous>, transform_indices = @transform_6, window_bounds = array<i64: 3, 1, 128>}, {pipeline_mode = #tpu.pipeline_mode<synchronous>, transform_indices = @transform_7, window_bounds = array<i64: 128, 128>}, {pipeline_mode = #tpu.pipeline_mode<synchronous>, transform_indices = @transform_8, window_bounds = array<i64: 1, 128>}, {transform_indices = @transform_9, window_bounds = array<i64: 32, 128>}]} {
    %c0 = arith.constant 0 : index
    %c0_0 = arith.constant 0 : index
    %0 = vector.load %arg1[%c0, %c0_0] : memref<32x128xbf16, #tpu.memory_space<vmem>>, vector<32x128xbf16>
    %c0_1 = arith.constant 0 : index
    %c0_2 = arith.constant 0 : index
    %1 = vector.load %arg2[%c0_1, %c0_2] : memref<128x128xbf16, #tpu.memory_space<vmem>>, vector<128x128xbf16>
    %cst = arith.constant dense<0.000000e+00> : vector<32x128xf32>
    %2 = tpu.matmul %0, %1, %cst {dimension_numbers = #tpu.dot_dimension_numbers<[1], [0], [0], [1], [0, 0, 1, 1], [], []>} : vector<32x128xbf16>, vector<128x128xbf16>, vector<32x128xf32> -> vector<32x128xf32>
    %c0_3 = arith.constant 0 : index
    %c0_4 = arith.constant 0 : index
    %3 = vector.load %arg3[%c0_3, %c0_4] : memref<1x128xf32, #tpu.memory_space<vmem>>, vector<1x128xf32>
    %4 = vector.broadcast %3 : vector<1x128xf32> to vector<32x128xf32>
    %5 = arith.addf %2, %4 : vector<32x128xf32>
    %cst_5 = arith.constant 0.000000e+00 : f32
    %6 = vector.broadcast %cst_5 : f32 to vector<32x128xf32>
    %7 = arith.maximumf %5, %6 : vector<32x128xf32>
    %c0_6 = arith.constant 0 : index
    %c0_7 = arith.constant 0 : index
    %8 = vector.load %arg11[%c0_6, %c0_7] : memref<32x128xf32, #tpu.memory_space<vmem>>, vector<32x128xf32>
    tpu.vector_store %arg11[%c0_6, %c0_7], %7 {strides = array<i32>} : memref<32x128xf32, #tpu.memory_space<vmem>>, vector<32x128xf32>,
    %c0_i32 = arith.constant 0 : i32
    %c0_8 = arith.constant 0 : index
    %c0_9 = arith.constant 0 : index
    %9 = vector.load %arg11[%c0_8, %c0_9] : memref<32x128xf32, #tpu.memory_space<vmem>>, vector<32x128xf32>
    %10 = arith.truncf %9 : vector<32x128xf32> to vector<32x128xbf16>
    %11 = arith.index_cast %c0_i32 : i32 to index
    %c0_10 = arith.constant 0 : index
    %c0_11 = arith.constant 0 : index
    %12 = vector.load %arg4[%11, %c0_10, %c0_11] : memref<3x128x128xbf16, #tpu.memory_space<vmem>>, vector<1x128x128xbf16>
    %13 = vector.shape_cast %12 : vector<1x128x128xbf16> to vector<128x128xbf16>
    %cst_12 = arith.constant dense<0.000000e+00> : vector<32x128xf32>
    %14 = tpu.matmul %10, %13, %cst_12 {dimension_numbers = #tpu.dot_dimension_numbers<[1], [0], [0], [1], [0, 0, 1, 1], [], []>} : vector<32x128xbf16>, vector<128x128xbf16>, vector<32x128xf32> -> vector<32x128xf32>
    %15 = arith.index_cast %c0_i32 : i32 to index
    %c0_13 = arith.constant 0 : index
    %c0_14 = arith.constant 0 : index
    %16 = vector.load %arg5[%15, %c0_13, %c0_14] : memref<3x1x128xf32, #tpu.memory_space<vmem>>, vector<1x1x128xf32>
    %17 = vector.shape_cast %16 : vector<1x1x128xf32> to vector<1x128xf32>
    %18 = vector.broadcast %17 : vector<1x128xf32> to vector<32x128xf32>
    %19 = arith.addf %14, %18 : vector<32x128xf32>
    %cst_15 = arith.constant 0.000000e+00 : f32
    %20 = vector.broadcast %cst_15 : f32 to vector<32x128xf32>
    %21 = arith.maximumf %19, %20 : vector<32x128xf32>
    %22 = arith.truncf %21 : vector<32x128xf32> to vector<32x128xbf16>
    %23 = arith.index_cast %c0_i32 : i32 to index
    %c0_16 = arith.constant 0 : index
    %c0_17 = arith.constant 0 : index
    %24 = vector.load %arg6[%23, %c0_16, %c0_17] : memref<3x128x128xbf16, #tpu.memory_space<vmem>>, vector<1x128x128xbf16>
    %25 = vector.shape_cast %24 : vector<1x128x128xbf16> to vector<128x128xbf16>
    %cst_18 = arith.constant dense<0.000000e+00> : vector<32x128xf32>
    %26 = tpu.matmul %22, %25, %cst_18 {dimension_numbers = #tpu.dot_dimension_numbers<[1], [0], [0], [1], [0, 0, 1, 1], [], []>} : vector<32x128xbf16>, vector<128x128xbf16>, vector<32x128xf32> -> vector<32x128xf32>
    %27 = arith.addf %9, %26 : vector<32x128xf32>
    %28 = arith.index_cast %c0_i32 : i32 to index
    %c0_19 = arith.constant 0 : index
    %c0_20 = arith.constant 0 : index
    %29 = vector.load %arg7[%28, %c0_19, %c0_20] : memref<3x1x128xf32, #tpu.memory_space<vmem>>, vector<1x1x128xf32>
    %30 = vector.shape_cast %29 : vector<1x1x128xf32> to vector<1x128xf32>
    %31 = vector.broadcast %30 : vector<1x128xf32> to vector<32x128xf32>
    %32 = arith.addf %27, %31 : vector<32x128xf32>
    %c0_21 = arith.constant 0 : index
    %c0_22 = arith.constant 0 : index
    %33 = vector.load %arg11[%c0_21, %c0_22] : memref<32x128xf32, #tpu.memory_space<vmem>>, vector<32x128xf32>
    tpu.vector_store %arg11[%c0_21, %c0_22], %32 {strides = array<i32>} : memref<32x128xf32, #tpu.memory_space<vmem>>, vector<32x128xf32>,
    %c1_i32 = arith.constant 1 : i32
    %c0_23 = arith.constant 0 : index
    %c0_24 = arith.constant 0 : index
    %34 = vector.load %arg11[%c0_23, %c0_24] : memref<32x128xf32, #tpu.memory_space<vmem>>, vector<32x128xf32>
    %35 = arith.truncf %34 : vector<32x128xf32> to vector<32x128xbf16>
    %36 = arith.index_cast %c1_i32 : i32 to index
    %c0_25 = arith.constant 0 : index
    %c0_26 = arith.constant 0 : index
    %37 = vector.load %arg4[%36, %c0_25, %c0_26] : memref<3x128x128xbf16, #tpu.memory_space<vmem>>, vector<1x128x128xbf16>
    %38 = vector.shape_cast %37 : vector<1x128x128xbf16> to vector<128x128xbf16>
    %cst_27 = arith.constant dense<0.000000e+00> : vector<32x128xf32>
    %39 = tpu.matmul %35, %38, %cst_27 {dimension_numbers = #tpu.dot_dimension_numbers<[1], [0], [0], [1], [0, 0, 1, 1], [], []>} : vector<32x128xbf16>, vector<128x128xbf16>, vector<32x128xf32> -> vector<32x128xf32>
    %40 = arith.index_cast %c1_i32 : i32 to index
    %c0_28 = arith.constant 0 : index
    %c0_29 = arith.constant 0 : index
    %41 = vector.load %arg5[%40, %c0_28, %c0_29] : memref<3x1x128xf32, #tpu.memory_space<vmem>>, vector<1x1x128xf32>
    %42 = vector.shape_cast %41 : vector<1x1x128xf32> to vector<1x128xf32>
    %43 = vector.broadcast %42 : vector<1x128xf32> to vector<32x128xf32>
    %44 = arith.addf %39, %43 : vector<32x128xf32>
    %cst_30 = arith.constant 0.000000e+00 : f32
    %45 = vector.broadcast %cst_30 : f32 to vector<32x128xf32>
    %46 = arith.maximumf %44, %45 : vector<32x128xf32>
    %47 = arith.truncf %46 : vector<32x128xf32> to vector<32x128xbf16>
    %48 = arith.index_cast %c1_i32 : i32 to index
    %c0_31 = arith.constant 0 : index
    %c0_32 = arith.constant 0 : index
    %49 = vector.load %arg6[%48, %c0_31, %c0_32] : memref<3x128x128xbf16, #tpu.memory_space<vmem>>, vector<1x128x128xbf16>
    %50 = vector.shape_cast %49 : vector<1x128x128xbf16> to vector<128x128xbf16>
    %cst_33 = arith.constant dense<0.000000e+00> : vector<32x128xf32>
    %51 = tpu.matmul %47, %50, %cst_33 {dimension_numbers = #tpu.dot_dimension_numbers<[1], [0], [0], [1], [0, 0, 1, 1], [], []>} : vector<32x128xbf16>, vector<128x128xbf16>, vector<32x128xf32> -> vector<32x128xf32>
    %52 = arith.addf %34, %51 : vector<32x128xf32>
    %53 = arith.index_cast %c1_i32 : i32 to index
    %c0_34 = arith.constant 0 : index
    %c0_35 = arith.constant 0 : index
    %54 = vector.load %arg7[%53, %c0_34, %c0_35] : memref<3x1x128xf32, #tpu.memory_space<vmem>>, vector<1x1x128xf32>
    %55 = vector.shape_cast %54 : vector<1x1x128xf32> to vector<1x128xf32>
    %56 = vector.broadcast %55 : vector<1x128xf32> to vector<32x128xf32>
    %57 = arith.addf %52, %56 : vector<32x128xf32>
    %c0_36 = arith.constant 0 : index
    %c0_37 = arith.constant 0 : index
    %58 = vector.load %arg11[%c0_36, %c0_37] : memref<32x128xf32, #tpu.memory_space<vmem>>, vector<32x128xf32>
    tpu.vector_store %arg11[%c0_36, %c0_37], %57 {strides = array<i32>} : memref<32x128xf32, #tpu.memory_space<vmem>>, vector<32x128xf32>,
    %c2_i32 = arith.constant 2 : i32
    %c0_38 = arith.constant 0 : index
    %c0_39 = arith.constant 0 : index
    %59 = vector.load %arg11[%c0_38, %c0_39] : memref<32x128xf32, #tpu.memory_space<vmem>>, vector<32x128xf32>
    %60 = arith.truncf %59 : vector<32x128xf32> to vector<32x128xbf16>
    %61 = arith.index_cast %c2_i32 : i32 to index
    %c0_40 = arith.constant 0 : index
    %c0_41 = arith.constant 0 : index
    %62 = vector.load %arg4[%61, %c0_40, %c0_41] : memref<3x128x128xbf16, #tpu.memory_space<vmem>>, vector<1x128x128xbf16>
    %63 = vector.shape_cast %62 : vector<1x128x128xbf16> to vector<128x128xbf16>
    %cst_42 = arith.constant dense<0.000000e+00> : vector<32x128xf32>
    %64 = tpu.matmul %60, %63, %cst_42 {dimension_numbers = #tpu.dot_dimension_numbers<[1], [0], [0], [1], [0, 0, 1, 1], [], []>} : vector<32x128xbf16>, vector<128x128xbf16>, vector<32x128xf32> -> vector<32x128xf32>
    %65 = arith.index_cast %c2_i32 : i32 to index
    %c0_43 = arith.constant 0 : index
    %c0_44 = arith.constant 0 : index
    %66 = vector.load %arg5[%65, %c0_43, %c0_44] : memref<3x1x128xf32, #tpu.memory_space<vmem>>, vector<1x1x128xf32>
    %67 = vector.shape_cast %66 : vector<1x1x128xf32> to vector<1x128xf32>
    %68 = vector.broadcast %67 : vector<1x128xf32> to vector<32x128xf32>
    %69 = arith.addf %64, %68 : vector<32x128xf32>
    %cst_45 = arith.constant 0.000000e+00 : f32
    %70 = vector.broadcast %cst_45 : f32 to vector<32x128xf32>
    %71 = arith.maximumf %69, %70 : vector<32x128xf32>
    %72 = arith.truncf %71 : vector<32x128xf32> to vector<32x128xbf16>
    %73 = arith.index_cast %c2_i32 : i32 to index
    %c0_46 = arith.constant 0 : index
    %c0_47 = arith.constant 0 : index
    %74 = vector.load %arg6[%73, %c0_46, %c0_47] : memref<3x128x128xbf16, #tpu.memory_space<vmem>>, vector<1x128x128xbf16>
    %75 = vector.shape_cast %74 : vector<1x128x128xbf16> to vector<128x128xbf16>
    %cst_48 = arith.constant dense<0.000000e+00> : vector<32x128xf32>
    %76 = tpu.matmul %72, %75, %cst_48 {dimension_numbers = #tpu.dot_dimension_numbers<[1], [0], [0], [1], [0, 0, 1, 1], [], []>} : vector<32x128xbf16>, vector<128x128xbf16>, vector<32x128xf32> -> vector<32x128xf32>
    %77 = arith.addf %59, %76 : vector<32x128xf32>
    %78 = arith.index_cast %c2_i32 : i32 to index
    %c0_49 = arith.constant 0 : index
    %c0_50 = arith.constant 0 : index
    %79 = vector.load %arg7[%78, %c0_49, %c0_50] : memref<3x1x128xf32, #tpu.memory_space<vmem>>, vector<1x1x128xf32>
    %80 = vector.shape_cast %79 : vector<1x1x128xf32> to vector<1x128xf32>
    %81 = vector.broadcast %80 : vector<1x128xf32> to vector<32x128xf32>
    %82 = arith.addf %77, %81 : vector<32x128xf32>
    %c0_51 = arith.constant 0 : index
    %c0_52 = arith.constant 0 : index
    %83 = vector.load %arg11[%c0_51, %c0_52] : memref<32x128xf32, #tpu.memory_space<vmem>>, vector<32x128xf32>
    tpu.vector_store %arg11[%c0_51, %c0_52], %82 {strides = array<i32>} : memref<32x128xf32, #tpu.memory_space<vmem>>, vector<32x128xf32>,
    %c3_i32 = arith.constant 3 : i32
    %c0_53 = arith.constant 0 : index
    %c0_54 = arith.constant 0 : index
    %84 = vector.load %arg11[%c0_53, %c0_54] : memref<32x128xf32, #tpu.memory_space<vmem>>, vector<32x128xf32>
    %85 = arith.truncf %84 : vector<32x128xf32> to vector<32x128xbf16>
    %c0_55 = arith.constant 0 : index
    %c0_56 = arith.constant 0 : index
    %86 = vector.load %arg8[%c0_55, %c0_56] : memref<128x128xbf16, #tpu.memory_space<vmem>>, vector<128x128xbf16>
    %cst_57 = arith.constant dense<0.000000e+00> : vector<32x128xf32>
    %87 = tpu.matmul %85, %86, %cst_57 {dimension_numbers = #tpu.dot_dimension_numbers<[1], [0], [0], [1], [0, 0, 1, 1], [], []>} : vector<32x128xbf16>, vector<128x128xbf16>, vector<32x128xf32> -> vector<32x128xf32>
    %c0_58 = arith.constant 0 : index
    %c0_59 = arith.constant 0 : index
    %88 = vector.load %arg9[%c0_58, %c0_59] : memref<1x128xf32, #tpu.memory_space<vmem>>, vector<1x128xf32>
    %89 = vector.broadcast %88 : vector<1x128xf32> to vector<32x128xf32>
    %90 = arith.addf %87, %89 : vector<32x128xf32>
    %91 = arith.truncf %90 : vector<32x128xf32> to vector<32x128xbf16>
    %c0_60 = arith.constant 0 : index
    %c0_61 = arith.constant 0 : index
    %92 = vector.load %arg10[%c0_60, %c0_61] : memref<32x128xbf16, #tpu.memory_space<vmem>>, vector<32x128xbf16>
    tpu.vector_store %arg10[%c0_60, %c0_61], %91 {strides = array<i32>} : memref<32x128xbf16, #tpu.memory_space<vmem>>, vector<32x128xbf16>,
    return
  }
  func.func @transform_0(%arg0: i32) -> (i32, i32) {
    %c0_i32 = arith.constant 0 : i32
    %c0_i32_0 = arith.constant 0 : i32
    return %arg0, %c0_i32 : i32, i32
  }
  func.func @transform_1(%arg0: i32) -> (i32, i32) {
    %c0_i32 = arith.constant 0 : i32
    %c0_i32_0 = arith.constant 0 : i32
    %c0_i32_1 = arith.constant 0 : i32
    return %c0_i32, %c0_i32_0 : i32, i32
  }
  func.func @transform_2(%arg0: i32) -> (i32, i32) {
    %c0_i32 = arith.constant 0 : i32
    %c0_i32_0 = arith.constant 0 : i32
    %c0_i32_1 = arith.constant 0 : i32
    return %c0_i32, %c0_i32_0 : i32, i32
  }
  func.func @transform_3(%arg0: i32) -> (i32, i32, i32) {
    %c0_i32 = arith.constant 0 : i32
    %c0_i32_0 = arith.constant 0 : i32
    %c0_i32_1 = arith.constant 0 : i32
    %c0_i32_2 = arith.constant 0 : i32
    return %c0_i32, %c0_i32_0, %c0_i32_1 : i32, i32, i32
  }
  func.func @transform_4(%arg0: i32) -> (i32, i32, i32) {
    %c0_i32 = arith.constant 0 : i32
    %c0_i32_0 = arith.constant 0 : i32
    %c0_i32_1 = arith.constant 0 : i32
    %c0_i32_2 = arith.constant 0 : i32
    return %c0_i32, %c0_i32_0, %c0_i32_1 : i32, i32, i32
  }
  func.func @transform_5(%arg0: i32) -> (i32, i32, i32) {
    %c0_i32 = arith.constant 0 : i32
    %c0_i32_0 = arith.constant 0 : i32
    %c0_i32_1 = arith.constant 0 : i32
    %c0_i32_2 = arith.constant 0 : i32
    return %c0_i32, %c0_i32_0, %c0_i32_1 : i32, i32, i32
  }
  func.func @transform_6(%arg0: i32) -> (i32, i32, i32) {
    %c0_i32 = arith.constant 0 : i32
    %c0_i32_0 = arith.constant 0 : i32
    %c0_i32_1 = arith.constant 0 : i32
    %c0_i32_2 = arith.constant 0 : i32
    return %c0_i32, %c0_i32_0, %c0_i32_1 : i32, i32, i32
  }
  func.func @transform_7(%arg0: i32) -> (i32, i32) {
    %c0_i32 = arith.constant 0 : i32
    %c0_i32_0 = arith.constant 0 : i32
    %c0_i32_1 = arith.constant 0 : i32
    return %c0_i32, %c0_i32_0 : i32, i32
  }
  func.func @transform_8(%arg0: i32) -> (i32, i32) {
    %c0_i32 = arith.constant 0 : i32
    %c0_i32_0 = arith.constant 0 : i32
    %c0_i32_1 = arith.constant 0 : i32
    return %c0_i32, %c0_i32_0 : i32, i32
  }
  func.func @transform_9(%arg0: i32) -> (i32, i32) {
    %c0_i32 = arith.constant 0 : i32
    %c0_i32_0 = arith.constant 0 : i32
    return %arg0, %c0_i32 : i32, i32
  }
}

</mosaic_0001>

<bundles_post_ra>
// kernel: tpu_custom_call.1
= control target key start
LH: loop header
LB: loop body
LE: loop exit
PB: predicated region body
PF: predicated region fallthrough
CT: control target
= control target key end

     0   :  { %s2791_s0 = inlined_call_operand.hbm [shape: bf16[64,128], index: 0, kind: input, shape index: {}]   ;;  %s2792_s1 = inlined_call_operand.hbm [shape: bf16[128,128], index: 1, kind: input, shape index: {}]   ;;  %s2793_s2 = inlined_call_operand.vmem [shape: f32[1,128], index: 2, kind: input, shape index: {}]   ;;  %s2794_s3 = inlined_call_operand.hbm [shape: bf16[3,128,128], index: 3, kind: input, shape index: {}]   ;;  %s2795_s4 = inlined_call_operand.vmem [shape: f32[3,1,128], index: 4, kind: input, shape index: {}]   ;;  %s2796_s5 = inlined_call_operand.hbm [shape: bf16[3,128,128], index: 5, kind: input, shape index: {}]   ;;  %s2797_s6 = inlined_call_operand.vmem [shape: f32[3,1,128], index: 6, kind: input, shape index: {}]   ;;  %s2798_s7 = inlined_call_operand.hbm [shape: bf16[128,128], index: 7, kind: input, shape index: {}]   ;;  %s2799_s8 = inlined_call_operand.vmem [shape: f32[1,128], index: 8, kind: input, shape index: {}]   ;;  %s2800_s9 = inlined_call_operand.hbm [shape: bf16[64,128], index: 9, kind: output, shape index: {}]  }
   0x1   :  { %2807 = sst [smem:[#allocation19_spill]] %s2800_s9 }
   0x2   :  { %14 = vsyncpa [#allocation4], 0 }
   0x3   :  { %16 = vsyncpa [#allocation4 + $0x1], 0 }
   0x4   :  { %17 = vsyncpa [#allocation7], 0 }
   0x5   :  { %18 = vsyncpa [#allocation10], 0 }
   0x6   :  { %19 = vsyncpa [#allocation5], 0 }
   0x7   :  { %21 = vsyncpa [#allocation5 + $0x1], 0  ;;  %s2423_s30 = smov 0   ;;  %s2425_s10 = smov 0  }
   0x8   :  { %s2427_s11 = smov 0   ;;  %s2429_s12 = smov 0  }
   0x9 LB: > { %2808 = sst [smem:[#allocation17_spill]] %s2349_s30  ;;  %s2444_s13 = sadd.s32 4294967295, %s2361_s12   ;;  %s2361_s12 = sphi %s2429_s12, %s2832_s12   ;;  %s2357_s11 = sphi %s2427_s11, %s2831_s11   ;;  %s2353_s10 = sphi %s2425_s10, %s2830_s10   ;;  %s2349_s30 = sphi %s2423_s30, %s2829_s30  }
   0xa   : > { %s1627_s14 = sadd.s32 4294967294, %s2361_s12   ;;  %p47_p0 = scmp.ne.s32.totalorder %s2353_s10, %s2349_s30 }
   0xb   : > { %p2801_p1 = scmp.eq.s32.totalorder %s2444_s13, 0  ;;  %p245_p3 = scmp.eq.s32.totalorder %s1627_s14, 1 }
   0xc   : > { %p1628_p5 = scmp.ge.s32.totalorder %s2361_s12, 1  ;;  %p252_p7 = scmp.lt.s32.totalorder %s2361_s12, 3 }
   0xd   : > { %p2453_p4 = por %p2801_p1, %p47_p0  ;;  %p2458_p6 = por %p245_p3, %p47_p0 }
   0xe   : > { %p2463_p8 = pnand %p1628_p5, %p252_p7  ;;  %s2363_s18 = smov [#allocation6]  }
   0xf   : > { %s2809_s15 = scalar_select %p2453_p4, 1, 0 }
  0x10   : > { %s2810_s16 = scalar_select %p2458_p6, 1, 0 }
  0x11   : > { %s2812_s17 = scalar_select %p2463_p8, 1, 0 }
  0x12   : > { %2811 = sst [smem:[#allocation18_spill]] %s2810_s16  ;;  %s264_s19 = sshll.u32 %s2363_s18, 4  ;;  %s2467_s19 = int_to_ptr.vmem [resolvable:$true] %s264_s19 }
  0x13   : > { %p2008_p9 = pneg %p2463_p8  ;;  %s2364_s21 = smov [#allocation9]  }
  0x14   : > { %s296_s22 = sshll.u32 %s2364_s21, 4  ;;  %s2365_s23 = smov [#allocation8]   ;;  %s2478_s22 = int_to_ptr.vmem [resolvable:$true] %s296_s22 }
  0x15   : > { %p2474_p11 = pnand %p2008_p9, %p2801_p1  ;;  %s2480_s24 = sshll.u32 %s2365_s23, 4  ;;  %s281_s24 = int_to_ptr.vmem [resolvable:$true] %s2480_s24 }
  0x16   : > { %s2145_s27 = scalar_lea.hbm %s2792_s1, 1024 }
  0x17   : > { %p2146_p12 = scmp.ne.s32.totalorder %s2792_s1, %s2145_s27  ;;  %p2490_p13 = pneg %p2474_p11 }
  0x18   : > { %p2152_p5 = scmp.lt.u32.totalorder %s2145_s27, %s2792_s1 }
  0x19   : > { %p2148_p0 = pnand %p2490_p13, %p2146_p12 }
  0x1b   : > { %p2149_p3 = pneg %p2148_p0 }
  0x1d   : > { %p2154_p7 = pnand %p2152_p5, %p2149_p3 }
  0x1f   : > { %2157 = shalt.err (!%p2154_p7)
}
  0x20   : > { %s2158_s23 = scalar_lea.vmem %s2467_s19, 1024  ;;  %p2166_p2 = scmp.lt.s32.totalorder %s2467_s19, %s2467_s19 }
  0x21   : > { %p2159_p9 = scmp.ne.s32.totalorder %s2467_s19, %s2158_s23  ;;  %p2167_p6 = scmp.lt.s32.totalorder %s2158_s23, %s2158_s23 }
  0x23   : > { %p2161_p10 = pnand %p2159_p9, %p2490_p13  ;;  %p2168_p12 = por %p2167_p6, %p2166_p2 }
  0x25   : > { %p2162_p1 = pneg %p2161_p10 }
  0x27   : > { %p2169_p0 = pnand %p2168_p12, %p2162_p1 }
  0x29   : > { %2172 = shalt.err (!%p2169_p0)
}
  0x2a   : > { %s2366_s25 = smov 64   ;;  %s2367_s26 = smov 4  }
  0x2b   : > { %2011 = dma.hbm_to_vmem [thread:$0]  (!%p2474_p11), %s2792_s1, 1024, %s2467_s19, [#allocation7], %s2366_s25, %s2366_s25, %s2367_s26  }
  0x2c   : > { %s2173_s21 = scalar_lea.hbm %s2796_s5, 3072 }
  0x2d   : > { %p2174_p1 = scmp.ne.s32.totalorder %s2796_s5, %s2173_s21  ;;  %p2180_p10 = scmp.lt.u32.totalorder %s2173_s21, %s2796_s5 }
  0x2f   : > { %p2176_p2 = pnand %p2174_p1, %p2490_p13 }
  0x31   : > { %p2177_p6 = pneg %p2176_p2 }
  0x33   : > { %p2182_p3 = pnand %p2180_p10, %p2177_p6 }
  0x35   : > { %2185 = shalt.err (!%p2182_p3)
}
  0x36   : > { %s2186_s19 = scalar_lea.vmem %s2478_s22, 3072  ;;  %p2194_p12 = scmp.lt.s32.totalorder %s2478_s22, %s2478_s22 }
  0x37   : > { %p2187_p5 = scmp.ne.s32.totalorder %s2478_s22, %s2186_s19  ;;  %p2195_p0 = scmp.lt.s32.totalorder %s2186_s19, %s2186_s19 }
  0x39   : > { %p2189_p7 = pnand %p2187_p5, %p2490_p13  ;;  %p2196_p1 = por %p2195_p0, %p2194_p12 }
  0x3b   : > { %p2190_p9 = pneg %p2189_p7 }
  0x3d   : > { %p2197_p2 = pnand %p2196_p1, %p2190_p9 }
  0x3f   : > { %2200 = shalt.err (!%p2197_p2)
}
  0x40   : > { %2017 = dma.hbm_to_vmem [thread:$0]  (!%p2474_p11), %s2796_s5, 3072, %s2478_s22, [#allocation10], %s2366_s25, %s2366_s25, %s2367_s26  }
  0x41   : > { %s2201_s28 = scalar_lea.hbm %s2794_s3, 3072 }
  0x42   : > { %p2202_p6 = scmp.ne.s32.totalorder %s2794_s3, %s2201_s28  ;;  %p2208_p5 = scmp.lt.u32.totalorder %s2201_s28, %s2794_s3 }
  0x44   : > { %p2204_p10 = pnand %p2202_p6, %p2490_p13 }
  0x46   : > { %p2205_p3 = pneg %p2204_p10 }
  0x48   : > { %p2210_p7 = pnand %p2208_p5, %p2205_p3 }
  0x4a   : > { %2213 = shalt.err (!%p2210_p7)
}
  0x4b   : > { %s2214_s19 = scalar_lea.vmem %s281_s24, 3072  ;;  %p2222_p1 = scmp.lt.s32.totalorder %s281_s24, %s281_s24 }
  0x4c   : > { %p2215_p9 = scmp.ne.s32.totalorder %s281_s24, %s2214_s19  ;;  %p2223_p2 = scmp.lt.s32.totalorder %s2214_s19, %s2214_s19 }
  0x4e   : > { %p2217_p12 = pnand %p2215_p9, %p2490_p13  ;;  %p2224_p4 = por %p2223_p2, %p2222_p1 }
  0x50   : > { %p2218_p0 = pneg %p2217_p12 }
  0x52   : > { %p2225_p8 = pnand %p2224_p4, %p2218_p0 }
  0x54   : > { %2228 = shalt.err (!%p2225_p8)
}
  0x55   : > { %2014 = dma.hbm_to_vmem [thread:$0]  (!%p2474_p11), %s2794_s3, 3072, %s281_s24, [#allocation7], %s2366_s25, %s2366_s25, %s2367_s26  }
  0x56   : > { %s2368_s30 = smov [#allocation11]   ;;  %s2229_s29 = scalar_lea.hbm %s2798_s7, 1024 }
  0x57   : > { %s312_s16 = sshll.u32 %s2368_s30, 4  ;;  %p2230_p4 = scmp.ne.s32.totalorder %s2798_s7, %s2229_s29  ;;  %s313_s16 = int_to_ptr.vmem [resolvable:$true] %s312_s16 }
  0x58   : > { %p2236_p10 = scmp.lt.u32.totalorder %s2229_s29, %s2798_s7 }
  0x59   : > { %p2232_p8 = pnand %p2230_p4, %p2490_p13 }
  0x5b   : > { %p2233_p6 = pneg %p2232_p8 }
  0x5d   : > { %p2238_p3 = pnand %p2236_p10, %p2233_p6 }
  0x5f   : > { %2241 = shalt.err (!%p2238_p3)
}
  0x60   : > { %s2242_s24 = scalar_lea.vmem %s313_s16, 1024  ;;  %p2250_p12 = scmp.lt.s32.totalorder %s313_s16, %s313_s16 }
  0x61   : > { %p2243_p5 = scmp.ne.s32.totalorder %s313_s16, %s2242_s24  ;;  %p2251_p0 = scmp.lt.s32.totalorder %s2242_s24, %s2242_s24 }
  0x63   : > { %p2245_p7 = pnand %p2243_p5, %p2490_p13  ;;  %p2252_p1 = por %p2251_p0, %p2250_p12 }
  0x65   : > { %p2246_p9 = pneg %p2245_p7 }
  0x67   : > { %p2253_p2 = pnand %p2252_p1, %p2246_p9 }
  0x69   : > { %2256 = shalt.err (!%p2253_p2)
}
  0x6a   : > { %2020 = dma.hbm_to_vmem [thread:$0]  (!%p2474_p11), %s2798_s7, 1024, %s313_s16, [#allocation10], %s2366_s25, %s2366_s25, %s2367_s26  }
  0x6b   : > { %s2584_s14 = sadd.s32 1, %s2361_s12   ;;  %s34_s20 = sadd.s32 1, %s2357_s11 }
  0x6c   : > { %s31_s30 = ssub.s32 %s2361_s12, %s2584_s14  ;;  %p41_p13 = scmp.ne.s32.totalorder %s2357_s11, %s2353_s10 }
  0x6d   : > { %p32_p4 = scmp.eq.s32.totalorder %s31_s30, 0  ;;  %p42_p8 = scmp.eq.s32.totalorder %s2361_s12, 0 }
  0x6e   : > { %p2815_p6 = scmp.eq.s32.totalorder %s2444_s13, 1  ;;  %p2033_p3 = scmp.lt.s32.totalorder %s2361_s12, 2 }
  0x6f   : > { %s2600_s28 = scalar_select %p32_p4, %s2357_s11, %s34_s20  }
  0x70   : > { %p2594_p10 = por %p2815_p6, %p41_p13  ;;  %p43_p5 = por %p42_p8, %p41_p13 }
  0x71   : > { %s329_s29 = sand.u32 1, %s2357_s11   ;;  %s1731_s16 = sshll.u32 %s2361_s12, 8 }
  0x72   : > { %s1634_s18 = sshll.u32 %s329_s29, 4  ;;  %s2607_s19 = scalar_lea.hbm %s2791_s0, %s1731_s16 }
  0x73   : > { %s333_s24 = scalar_lea.vmem [#allocation3], %s1634_s18  ;;  %p2611_p11 = pnand %p2033_p3, %p43_p5 }
  0x74   : > { %s340_s22 = sshll.u32 %s333_s24, 4  ;;  %s2615_s20 = scalar_lea.sflag [#allocation4], %s329_s29  ;;  %s2609_s22 = int_to_ptr.vmem [resolvable:$true] %s340_s22 }
  0x75   : > { %s2257_s30 = scalar_lea.hbm %s2607_s19, 256  ;;  %p2259_p9 = pneg %p2611_p11 }
  0x76   : > { %p2258_p7 = scmp.ne.s32.totalorder %s2607_s19, %s2257_s30  ;;  %s2262_s21 = scalar_lea.hbm %s2791_s0, 512 }
  0x77   : > { %p2263_p1 = scmp.lt.u32.totalorder %s2607_s19, %s2791_s0  ;;  %p2264_p2 = scmp.lt.u32.totalorder %s2262_s21, %s2257_s30 }
  0x78   : > { %p2260_p12 = pnand %p2259_p9, %p2258_p7  ;;  %p2266_p4 = scmp.lt.u32.totalorder %s2257_s30, %s2607_s19 }
  0x79   : > { %p2265_p13 = por %p2264_p2, %p2263_p1 }
  0x7a   : > { %p2261_p0 = pneg %p2260_p12 }
  0x7b   : > { %p2267_p8 = por %p2266_p4, %p2265_p13 }
  0x7d   : > { %p2268_p6 = pnand %p2267_p8, %p2261_p0 }
  0x7f   : > { %2271 = shalt.err (!%p2268_p6)
}
  0x80   : > { %s2272_s29 = scalar_lea.vmem %s2609_s22, 256  ;;  %s2369_s18 = smov [#allocation3]  }
  0x81   : > { %p2273_p3 = scmp.ne.s32.totalorder %s2609_s22, %s2272_s29  ;;  %s2277_s16 = sshll.u32 %s2369_s18, 4  ;;  %s2278_s16 = int_to_ptr.vmem [resolvable:$false] %s2277_s16 }
  0x82   : > { %s2279_s23 = scalar_lea.vmem %s2278_s16, 512  ;;  %p2280_p12 = scmp.lt.s32.totalorder %s2609_s22, %s2278_s16 }
  0x83   : > { %p2275_p5 = pnand %p2273_p3, %p2259_p9  ;;  %p2281_p1 = scmp.lt.s32.totalorder %s2279_s23, %s2272_s29 }
  0x85   : > { %p2276_p7 = pneg %p2275_p5  ;;  %p2282_p2 = por %p2281_p1, %p2280_p12 }
  0x87   : > { %p2283_p13 = pnand %p2282_p2, %p2276_p7 }
  0x89   : > { %2286 = shalt.err (!%p2283_p13)
}
  0x8a   : > { %2024 = dma.hbm_to_vmem [thread:$0]  (!%p2611_p11), %s2607_s19, 256, %s2609_s22, %s2615_s20, %s2366_s25, %s2366_s25, %s2367_s26  }
  0x8b   : > { %p2818_p9 = scmp.ne.s32.totalorder %s2812_s17, 0 }
  0x8c   : > { %s2649_s30 = sand.u32 (!%p2818_p9), 1, %s2353_s10   ;;  %p2819_p0 = scmp.ne.s32.totalorder (!%p2818_p9), %s2809_s15, 0 }
  0x8d   : > { %352 = sbr.rel (%p2818_p9) target bundleno = 1977 (0x7b9), region = 56  ;;  %s1638_s21 = sshll.u32 (!%p2818_p9), %s2649_s30, 4 }
  0x8e   : > { %s355_s24 = scalar_lea.sflag (!%p2818_p9), [#allocation4], %s2649_s30  ;;  %s2655_s9 = scalar_lea.vmem (!%p2818_p9), [#allocation3], %s1638_s21 }
  0x94   : > { %2332 = dma.done.wait (%p2819_p0), %s355_s24, 256  }
  0x95   : > { %2334 = vsyncadd (%p2819_p0), %s355_s24, 4294967040  ;;  %p2820_p11 = scmp.eq.s32.totalorder %s2444_s13, 0 }
  0x97   : > { %2336 = dma.done.wait (%p2820_p11), [#allocation7], 4096   ;;  %p2821_p4 = pmov %p2820_p11 }
  0x99   : > { %2338 = vsyncadd (%p2821_p4), [#allocation7], 4294963200  ;;  %p2822_p8 = pmov %p2821_p4 }
  0x9a   : > { %p2823_p6 = pmov %p2821_p4 }
  0x9b   : > { %2340 = dma.done.wait (%p2822_p8), [#allocation10], 4096  }
  0x9c   : > { %2342 = vsyncadd (%p2823_p6), [#allocation10], 4294963200  ;;  %v2079_v0 = vld [vmem:[#allocation6] sm:$0xff]   ;;  %v2080_v1 = vld [vmem:[#allocation6 + $0x8] sm:$0xff]   ;;  %s408_s26 = scalar_lea.vmem [#allocation12], %s1638_s21  ;;  %s1736_s22 = sshll.u32 %s2444_s13, 8 }
  0x9d   : > { %1828 = vmatprep.subr.bf16.mxu0 %v2079_v0  ;;  %v2081_v2 = vld [vmem:[#allocation6 + $0x10] sm:$0xff]   ;;  %v2082_v3 = vld [vmem:[#allocation6 + $0x18] sm:$0xff]   ;;  %v2089_v5 = vld [vmem:[#allocation8] sm:$0xff]   ;;  %s1516_s19 = sshll.u32 %s408_s26, 4  ;;  %s2824_s18 = sld [smem:[#allocation19_spill]]  ;;  %s2742_s19 = int_to_ptr.vmem [resolvable:$true] %s1516_s19 }
  0x9e   : > { %1829 = vmatpush3.bf16.msra.mxu0 %v2079_v0  ;;  %v2087_v4 = vld [vmem:[%s2655_s9] sm:$0xff]   ;;  %v2090_v6 = vld [vmem:[#allocation8 + $0x8] sm:$0xff]   ;;  %1848 = vmatprep.subr.bf16.mxu1 %v2089_v5  ;;  %v2092_v10 = vld [vmem:[#allocation8 + $0x18] sm:$0xff]   ;;  %s1503_s13 = scalar_lea.sflag [#allocation5], %s2649_s30  ;;  %s2287_s21 = scalar_lea.vmem %s2742_s19, 256 }
  0x9f   : > { %1830 = vmatprep.subr.bf16.mxu0 %v2080_v1  ;;  %1844 = vmatprep.mubr.bf16.mxu0 %v2087_v4  ;;  %v2083_v7 = vld [vmem:[#allocation6 + $0x20] sm:$0xff]   ;;  %v2091_v8 = vld [vmem:[#allocation8 + $0x10] sm:$0xff]   ;;  %v2084_v9 = vld [vmem:[#allocation6 + $0x28] sm:$0xff]   ;;  %p2288_p3 = scmp.ne.s32.totalorder %s2742_s19, %s2287_s21  ;;  %s2370_s23 = smov [#allocation12]  }
  0xa0   : > { %1849 = vmatpush3.bf16.msra.mxu1 %v2089_v5  ;;  %v2085_v11 = vld [vmem:[#allocation6 + $0x30] sm:$0xff]   ;;  %v2093_v12 = vld [vmem:[#allocation8 + $0x20] sm:$0xff]   ;;  %v2086_v13 = vld [vmem:[#allocation6 + $0x38] sm:$0xff]   ;;  %s2291_s24 = sshll.u32 %s2370_s23, 4  ;;  %s2292_s24 = int_to_ptr.vmem [resolvable:$false] %s2291_s24 }
  0xa1   : > { %1850 = vmatprep.subr.bf16.mxu1 %v2090_v6  ;;  %v2094_v14 = vld [vmem:[#allocation8 + $0x28] sm:$0xff]   ;;  %v2095_v16 = vld [vmem:[#allocation8 + $0x30] sm:$0xff]   ;;  %v2096_v17 = vld [vmem:[#allocation8 + $0x38] sm:$0xff]   ;;  %p2289_p5 = pnand %p2288_p3, %p2594_p10  ;;  %p2294_p12 = scmp.lt.s32.totalorder %s2742_s19, %s2292_s24 }
  0xa2   : > { %1831 = vmatpush3.bf16.msra.mxu0 %v2080_v1  ;;  %v2088_v15 = vld [vmem:[%s2655_s9 + $0x8] sm:$0xff]   ;;  %v2097_v18 = vld [vmem:[#allocation9] sm:$0xff]   ;;  %v2099_v20 = vld [vmem:[#allocation9 + $0x10] sm:$0xff]   ;;  %s2293_s9 = scalar_lea.vmem %s2292_s24, 512 }
  0xa3   : > { %1832 = vmatprep.subr.bf16.mxu0 %v2081_v2  ;;  %v2098_v19 = vld [vmem:[#allocation9 + $0x8] sm:$0xff]   ;;  %v2100_v21 = vld [vmem:[#allocation9 + $0x18] sm:$0xff]   ;;  %v2101_v22 = vld [vmem:[#allocation9 + $0x20] sm:$0xff]   ;;  %s2747_s16 = scalar_lea.hbm %s2824_s18, %s1736_s22  ;;  %p2290_p7 = pneg %p2289_p5 }
  0xa4   : > { %1851 = vmatpush3.bf16.msra.mxu1 %v2090_v6  ;;  %v2102_v23 = vld [vmem:[#allocation9 + $0x28] sm:$0xff]   ;;  %v1644_v24 = vld [vmem:[%s2793_s2] ss:$0 sm:$0xff]  ;;  %v2103_v39 = vld [vmem:[#allocation9 + $0x30] sm:$0xff]   ;;  %p2295_p1 = scmp.lt.s32.totalorder %s2293_s9, %s2287_s21 }
  0xa5   : > { %1852 = vmatprep.subr.bf16.mxu1 %v2091_v8  ;;  %v2104_v40 = vld [vmem:[#allocation9 + $0x38] sm:$0xff]   ;;  %v2105_v41 = vld [vmem:[#allocation8 + $0x40] sm:$0xff]   ;;  %v2106_v42 = vld [vmem:[#allocation8 + $0x48] sm:$0xff]  }
  0xa6   : > { %1833 = vmatpush3.bf16.msra.mxu0 %v2081_v2  ;;  %v2107_v43 = vld [vmem:[#allocation8 + $0x50] sm:$0xff]   ;;  %v2108_v44 = vld [vmem:[#allocation8 + $0x58] sm:$0xff]   ;;  %v2109_v45 = vld [vmem:[#allocation8 + $0x60] sm:$0xff]   ;;  %p2296_p2 = por %p2295_p1, %p2294_p12 }
  0xa7   : > { %1834 = vmatprep.subr.bf16.mxu0 %v2082_v3  ;;  %v2110_v46 = vld [vmem:[#allocation8 + $0x68] sm:$0xff]   ;;  %v1655_v47 = vld [vmem:[%s2795_s4] ss:$0 sm:$0xff]  ;;  %v2111_v62 = vld [vmem:[#allocation8 + $0x70] sm:$0xff]  }
  0xa8   : > { %1853 = vmatpush3.bf16.msra.mxu1 %v2091_v8  ;;  %v2112_v63 = vld [vmem:[#allocation8 + $0x78] sm:$0xff]   ;;  %v2113_v0 = vld [vmem:[#allocation9 + $0x40] sm:$0xff]   ;;  %v2114_v1 = vld [vmem:[#allocation9 + $0x48] sm:$0xff]   ;;  %p2297_p13 = pnand %p2296_p2, %p2290_p7 }
  0xa9   : > { %1854 = vmatprep.subr.bf16.mxu1 %v2092_v10  ;;  %v2115_v2 = vld [vmem:[#allocation9 + $0x50] sm:$0xff]   ;;  %v2117_v4 = vld [vmem:[#allocation9 + $0x60] sm:$0xff]   ;;  %v2118_v5 = vld [vmem:[#allocation9 + $0x68] sm:$0xff]  }
  0xaa   : > { %1835 = vmatpush3.bf16.msra.mxu0 %v2082_v3  ;;  %v2116_v3 = vld [vmem:[#allocation9 + $0x58] sm:$0xff]  }
  0xab   : > { %1836 = vmatprep.subr.bf16.mxu0 %v2083_v7 }
  0xac   : > { %1855 = vmatpush3.bf16.msra.mxu1 %v2092_v10 }
  0xad   : > { %1856 = vmatprep.subr.bf16.mxu1 %v2093_v12 }
  0xae   : > { %1837 = vmatpush3.bf16.msra.mxu0 %v2083_v7 }
  0xaf   : > { %1838 = vmatprep.subr.bf16.mxu0 %v2084_v9 }
  0xb0   : > { %1857 = vmatpush3.bf16.msra.mxu1 %v2093_v12 }
  0xb1   : > { %1858 = vmatprep.subr.bf16.mxu1 %v2094_v14 }
  0xb2   : > { %1839 = vmatpush3.bf16.msra.mxu0 %v2084_v9 }
  0xb3   : > { %1840 = vmatprep.subr.bf16.mxu0 %v2085_v11 }
  0xb4   : > { %1859 = vmatpush3.bf16.msra.mxu1 %v2094_v14 }
  0xb5   : > { %1860 = vmatprep.subr.bf16.mxu1 %v2095_v16 }
  0xb6   : > { %1841 = vmatpush3.bf16.msra.mxu0 %v2085_v11  ;;  %v1672_v11 = vld [vmem:[%s2797_s6] ss:$0 sm:$0xff] }
  0xb7   : > { %1842 = vmatprep.subr.bf16.mxu0 %v2086_v13 }
  0xb8   : > { %1861 = vmatpush3.bf16.msra.mxu1 %v2095_v16 }
  0xb9   : > { %1862 = vmatprep.subr.bf16.mxu1 %v2096_v17 }
  0xba   : > { %1843 = vmatpush3.bf16.msra.mxu0 %v2086_v13 }
  0xbb   : > { %1868 = vmatprep.subr.bf16.mxu0 %v2097_v18 }
  0xbc   : > { %1863 = vmatpush3.bf16.msra.mxu1 %v2096_v17 }
  0xbd   : > { %1845 = vmatmul.mubr.bf16.vlgmr.msra.gmra.mrb[0].mxu0 %v2088_v15  ;;  %1888 = vmatprep.subr.bf16.mxu1 %v2105_v41 }
  0xbe   : > { %1869 = vmatpush3.bf16.msra.mxu0 %v2097_v18 }
  0xbf   : > { %1870 = vmatprep.subr.bf16.mxu0 %v2098_v19 }
  0xc2   : > { %1871 = vmatpush3.bf16.msra.mxu0 %v2098_v19 }
  0xc3   : > { %1872 = vmatprep.subr.bf16.mxu0 %v2099_v20 }
  0xc6   : > { %1873 = vmatpush3.bf16.msra.mxu0 %v2099_v20 }
  0xc7   : > { %1874 = vmatprep.subr.bf16.mxu0 %v2100_v21 }
  0xca   : > { %1875 = vmatpush3.bf16.msra.mxu0 %v2100_v21  ;;  %v2119_v21 = vld [vmem:[#allocation9 + $0x70] sm:$0xff]  }
  0xcb   : > { %1876 = vmatprep.subr.bf16.mxu0 %v2101_v22 }
  0xce   : > { %1877 = vmatpush3.bf16.msra.mxu0 %v2101_v22  ;;  %v2120_v22 = vld [vmem:[#allocation9 + $0x78] sm:$0xff]  }
  0xcf   : > { %1878 = vmatprep.subr.bf16.mxu0 %v2102_v23 }
  0xd2   : > { %1879 = vmatpush3.bf16.msra.mxu0 %v2102_v23  ;;  %v2121_v23 = vld [vmem:[#allocation8 + $0x80] sm:$0xff]  }
  0xd3   : > { %1880 = vmatprep.subr.bf16.mxu0 %v2103_v39 }
  0xd6   : > { %1881 = vmatpush3.bf16.msra.mxu0 %v2103_v39 }
  0xd7   : > { %1882 = vmatprep.subr.bf16.mxu0 %v2104_v40 }
  0xda   : > { %1883 = vmatpush3.bf16.msra.mxu0 %v2104_v40 }
  0xdb   : > { %1908 = vmatprep.subr.bf16.mxu0 %v2113_v0 }
 0x190   : > { %v1846_v25 = vpop.f32.mrb[0].mxu0 }
 0x191   : > { %v533_v26 = vpop.f32.mrb[1].mxu0  ;;  %v2676_v29 = vadd.f32 %v1846_v25, %v1644_v24  ;;  %v2123_v25 = vld [vmem:[#allocation8 + $0x90] sm:$0xff]  }
 0x192   : > { %v2674_v27 = vadd.f32 %v1644_v24, %v533_v26  ;;  %v1847_v28 = vpop.f32.mrb[2].mxu0  ;;  %v2124_v26 = vld [vmem:[#allocation8 + $0x98] sm:$0xff]  }
 0x193   : > { %v2678_v30 = vadd.f32 %v1847_v28, %v1644_v24  ;;  %v536_v31 = vpop.f32.mrb[3].mxu0  ;;  %v550_v36 = vmax.f32 %v2676_v29, 0.0  ;;  %v2126_v28 = vld [vmem:[#allocation8 + $0xa8] sm:$0xff]   ;;  %v1674_v29 = vld [vmem:[%s2795_s4 + $0x1] ss:$0 sm:$0xff] }
 0x194   : > { %v2680_v32 = vadd.f32 %v1644_v24, %v536_v31  ;;  %v548_v34 = vmax.f32 %v2674_v27, 0.0  ;;  %v2122_v24 = vld [vmem:[#allocation8 + $0x88] sm:$0xff]   ;;  %v2125_v27 = vld [vmem:[#allocation8 + $0xa0] sm:$0xff]  }
 0x195   : > { %v551_v33 = vmax.f32 %v2678_v30, 0.0 }
 0x196   : > { %v549_v35 = vmax.f32 %v2680_v32, 0.0 }
 0x197   : > { %v561_v38 = vpack.c.bf16 %v551_v33, %v550_v36 }
 0x198   : > { %v560_v37 = vpack.c.bf16 %v549_v35, %v548_v34 }
 0x19a   : > { %1864 = vmatprep.mubr.bf16.mxu1 %v560_v37 }
 0x19b   : > { %1865 = vmatmul.mubr.bf16.vlgmr.msra.gmra.mrb[0].mxu1 %v561_v38 }
 0x19c   : > { %1889 = vmatpush3.bf16.msra.mxu1 %v2105_v41 }
 0x19d   : > { %1890 = vmatprep.subr.bf16.mxu1 %v2106_v42 }
 0x1a0   : > { %1891 = vmatpush3.bf16.msra.mxu1 %v2106_v42 }
 0x1a1   : > { %1892 = vmatprep.subr.bf16.mxu1 %v2107_v43 }
 0x1a4   : > { %1893 = vmatpush3.bf16.msra.mxu1 %v2107_v43 }
 0x1a5   : > { %1894 = vmatprep.subr.bf16.mxu1 %v2108_v44 }
 0x1a8   : > { %1895 = vmatpush3.bf16.msra.mxu1 %v2108_v44  ;;  %v2127_v44 = vld [vmem:[#allocation8 + $0xb0] sm:$0xff]  }
 0x1a9   : > { %1896 = vmatprep.subr.bf16.mxu1 %v2109_v45 }
 0x1ac   : > { %1897 = vmatpush3.bf16.msra.mxu1 %v2109_v45  ;;  %v2128_v45 = vld [vmem:[#allocation8 + $0xb8] sm:$0xff]  }
 0x1ad   : > { %1898 = vmatprep.subr.bf16.mxu1 %v2110_v46 }
 0x1b0   : > { %1899 = vmatpush3.bf16.msra.mxu1 %v2110_v46  ;;  %v2129_v46 = vld [vmem:[#allocation9 + $0x80] sm:$0xff]  }
 0x1b1   : > { %1900 = vmatprep.subr.bf16.mxu1 %v2111_v62 }
 0x1b4   : > { %1901 = vmatpush3.bf16.msra.mxu1 %v2111_v62 }
 0x1b5   : > { %1902 = vmatprep.subr.bf16.mxu1 %v2112_v63 }
 0x1b8   : > { %1903 = vmatpush3.bf16.msra.mxu1 %v2112_v63 }
 0x1b9   : > { %1928 = vmatprep.subr.bf16.mxu1 %v2121_v23 }
 0x26e   : > { %v1866_v48 = vpop.f32.mrb[0].mxu1 }
 0x26f   : > { %v676_v49 = vadd.f32 %v1866_v48, %v1655_v47  ;;  %v667_v50 = vpop.f32.mrb[1].mxu1  ;;  %v2131_v48 = vld [vmem:[#allocation9 + $0x90] sm:$0xff]  }
 0x270   : > { %v668_v51 = vadd.f32 %v1655_v47, %v667_v50  ;;  %v1867_v52 = vpop.f32.mrb[2].mxu1  ;;  %v2133_v50 = vld [vmem:[#allocation9 + $0xa0] sm:$0xff]  }
 0x271   : > { %v679_v53 = vadd.f32 %v1867_v52, %v1655_v47  ;;  %v670_v54 = vpop.f32.mrb[3].mxu1  ;;  %v684_v56 = vmax.f32 %v676_v49, 0.0  ;;  %v2132_v49 = vld [vmem:[#allocation9 + $0x98] sm:$0xff]  }
 0x272   : > { %v671_v55 = vadd.f32 %v1655_v47, %v670_v54  ;;  %v682_v58 = vmax.f32 %v668_v51, 0.0  ;;  %v2130_v47 = vld [vmem:[#allocation9 + $0x88] sm:$0xff]  }
 0x273   : > { %v685_v57 = vmax.f32 %v679_v53, 0.0  ;;  %v2134_v51 = vld [vmem:[#allocation9 + $0xa8] sm:$0xff]  }
 0x274   : > { %v683_v59 = vmax.f32 %v671_v55, 0.0 }
 0x275   : > { %v687_v60 = vpack.c.bf16 %v685_v57, %v684_v56  ;;  %v1692_v57 = vld [vmem:[%s2797_s6 + $0x1] ss:$0 sm:$0xff] }
 0x276   : > { %v686_v61 = vpack.c.bf16 %v683_v59, %v682_v58 }
 0x278   : > { %1884 = vmatprep.mubr.bf16.mxu0 %v686_v61 }
 0x279   : > { %1885 = vmatmul.mubr.bf16.vlgmr.msra.gmra.mrb[4].mxu0 %v687_v60 }
 0x27a   : > { %1909 = vmatpush3.bf16.msra.mxu0 %v2113_v0 }
 0x27b   : > { %1910 = vmatprep.subr.bf16.mxu0 %v2114_v1 }
 0x27e   : > { %1911 = vmatpush3.bf16.msra.mxu0 %v2114_v1 }
 0x27f   : > { %1912 = vmatprep.subr.bf16.mxu0 %v2115_v2 }
 0x282   : > { %1913 = vmatpush3.bf16.msra.mxu0 %v2115_v2 }
 0x283   : > { %1914 = vmatprep.subr.bf16.mxu0 %v2116_v3 }
 0x286   : > { %1915 = vmatpush3.bf16.msra.mxu0 %v2116_v3  ;;  %v2135_v3 = vld [vmem:[#allocation9 + $0xb0] sm:$0xff]  }
 0x287   : > { %1916 = vmatprep.subr.bf16.mxu0 %v2117_v4 }
 0x28a   : > { %1917 = vmatpush3.bf16.msra.mxu0 %v2117_v4  ;;  %v2136_v4 = vld [vmem:[#allocation9 + $0xb8] sm:$0xff]  }
 0x28b   : > { %1918 = vmatprep.subr.bf16.mxu0 %v2118_v5 }
 0x28e   : > { %1919 = vmatpush3.bf16.msra.mxu0 %v2118_v5  ;;  %v2137_v5 = vld [vmem:[#allocation11] sm:$0xff]  }
 0x28f   : > { %1920 = vmatprep.subr.bf16.mxu0 %v2119_v21 }
 0x292   : > { %1921 = vmatpush3.bf16.msra.mxu0 %v2119_v21 }
 0x293   : > { %1922 = vmatprep.subr.bf16.mxu0 %v2120_v22 }
 0x296   : > { %1923 = vmatpush3.bf16.msra.mxu0 %v2120_v22 }
 0x297   : > { %1948 = vmatprep.subr.bf16.mxu0 %v2129_v46 }
 0x34c   : > { %v1886_v6 = vpop.f32.mrb[4].mxu0 }
 0x34d   : > { %v786_v7 = vpop.f32.mrb[5].mxu0  ;;  %v803_v10 = vadd.f32 %v1886_v6, %v550_v36  ;;  %v2138_v6 = vld [vmem:[#allocation11 + $0x8] sm:$0xff]  }
 0x34e   : > { %v801_v8 = vadd.f32 %v786_v7, %v548_v34  ;;  %v1887_v9 = vpop.f32.mrb[6].mxu0  ;;  %v2139_v7 = vld [vmem:[#allocation11 + $0x10] sm:$0xff]  }
 0x34f   : > { %v804_v12 = vadd.f32 %v1887_v9, %v551_v33  ;;  %v789_v13 = vpop.f32.mrb[7].mxu0  ;;  %v2714_v18 = vadd.f32 %v1672_v11, %v803_v10  ;;  %v2141_v9 = vld [vmem:[#allocation11 + $0x20] sm:$0xff]   ;;  %v2142_v10 = vld [vmem:[#allocation11 + $0x28] sm:$0xff]  }
 0x350   : > { %v802_v14 = vadd.f32 %v789_v13, %v549_v35  ;;  %v2710_v16 = vadd.f32 %v1672_v11, %v801_v8  ;;  %v2140_v8 = vld [vmem:[#allocation11 + $0x18] sm:$0xff]  }
 0x351   : > { %v2708_v15 = vadd.f32 %v1672_v11, %v804_v12 }
 0x352   : > { %v2712_v17 = vadd.f32 %v1672_v11, %v802_v14  ;;  %v1694_v11 = vld [vmem:[%s2795_s4 + $0x2] ss:$0 sm:$0xff] }
 0x353   : > { %v825_v20 = vpack.c.bf16 %v2708_v15, %v2714_v18 }
 0x354   : > { %v824_v19 = vpack.c.bf16 %v2712_v17, %v2710_v16 }
 0x356   : > { %1904 = vmatprep.mubr.bf16.mxu1 %v824_v19 }
 0x357   : > { %1905 = vmatmul.mubr.bf16.vlgmr.msra.gmra.mrb[4].mxu1 %v825_v20 }
 0x358   : > { %1929 = vmatpush3.bf16.msra.mxu1 %v2121_v23 }
 0x359   : > { %1930 = vmatprep.subr.bf16.mxu1 %v2122_v24 }
 0x35c   : > { %1931 = vmatpush3.bf16.msra.mxu1 %v2122_v24 }
 0x35d   : > { %1932 = vmatprep.subr.bf16.mxu1 %v2123_v25 }
 0x360   : > { %1933 = vmatpush3.bf16.msra.mxu1 %v2123_v25 }
 0x361   : > { %1934 = vmatprep.subr.bf16.mxu1 %v2124_v26 }
 0x364   : > { %1935 = vmatpush3.bf16.msra.mxu1 %v2124_v26  ;;  %v2143_v26 = vld [vmem:[#allocation11 + $0x30] sm:$0xff]  }
 0x365   : > { %1936 = vmatprep.subr.bf16.mxu1 %v2125_v27 }
 0x368   : > { %1937 = vmatpush3.bf16.msra.mxu1 %v2125_v27  ;;  %v2144_v27 = vld [vmem:[#allocation11 + $0x38] sm:$0xff]  }
 0x369   : > { %1938 = vmatprep.subr.bf16.mxu1 %v2126_v28 }
 0x36c   : > { %1939 = vmatpush3.bf16.msra.mxu1 %v2126_v28 }
 0x36d   : > { %1940 = vmatprep.subr.bf16.mxu1 %v2127_v44 }
 0x370   : > { %1941 = vmatpush3.bf16.msra.mxu1 %v2127_v44  ;;  %v1713_v44 = vld [vmem:[%s2799_s8] ss:$0 sm:$0xff] }
 0x371   : > { %1942 = vmatprep.subr.bf16.mxu1 %v2128_v45 }
 0x374   : > { %1943 = vmatpush3.bf16.msra.mxu1 %v2128_v45 }
 0x375   : > { %1968 = vmatprep.subr.bf16.mxu1 %v2137_v5 }
 0x42a   : > { %v1906_v30 = vpop.f32.mrb[4].mxu1 }
 0x42b   : > { %v942_v31 = vadd.f32 %v1906_v30, %v1674_v29  ;;  %v933_v32 = vpop.f32.mrb[5].mxu1 }
 0x42c   : > { %v934_v33 = vadd.f32 %v1674_v29, %v933_v32  ;;  %v1907_v34 = vpop.f32.mrb[6].mxu1 }
 0x42d   : > { %v945_v35 = vadd.f32 %v1907_v34, %v1674_v29  ;;  %v936_v36 = vpop.f32.mrb[7].mxu1  ;;  %v950_v38 = vmax.f32 %v942_v31, 0.0  ;;  %v1712_v31 = vld [vmem:[%s2797_s6 + $0x2] ss:$0 sm:$0xff] }
 0x42e   : > { %v937_v37 = vadd.f32 %v1674_v29, %v936_v36  ;;  %v948_v40 = vmax.f32 %v934_v33, 0.0 }
 0x42f   : > { %v951_v39 = vmax.f32 %v945_v35, 0.0 }
 0x430   : > { %v949_v41 = vmax.f32 %v937_v37, 0.0 }
 0x431   : > { %v953_v42 = vpack.c.bf16 %v951_v39, %v950_v38 }
 0x432   : > { %v952_v43 = vpack.c.bf16 %v949_v41, %v948_v40 }
 0x434   : > { %1924 = vmatprep.mubr.bf16.mxu0 %v952_v43 }
 0x435   : > { %1925 = vmatmul.mubr.bf16.vlgmr.msra.gmra.mrb[8].mxu0 %v953_v42 }
 0x436   : > { %1949 = vmatpush3.bf16.msra.mxu0 %v2129_v46 }
 0x437   : > { %1950 = vmatprep.subr.bf16.mxu0 %v2130_v47 }
 0x43a   : > { %1951 = vmatpush3.bf16.msra.mxu0 %v2130_v47 }
 0x43b   : > { %1952 = vmatprep.subr.bf16.mxu0 %v2131_v48 }
 0x43e   : > { %1953 = vmatpush3.bf16.msra.mxu0 %v2131_v48 }
 0x43f   : > { %1954 = vmatprep.subr.bf16.mxu0 %v2132_v49 }
 0x442   : > { %1955 = vmatpush3.bf16.msra.mxu0 %v2132_v49 }
 0x443   : > { %1956 = vmatprep.subr.bf16.mxu0 %v2133_v50 }
 0x446   : > { %1957 = vmatpush3.bf16.msra.mxu0 %v2133_v50 }
 0x447   : > { %1958 = vmatprep.subr.bf16.mxu0 %v2134_v51 }
 0x44a   : > { %1959 = vmatpush3.bf16.msra.mxu0 %v2134_v51 }
 0x44b   : > { %1960 = vmatprep.subr.bf16.mxu0 %v2135_v3 }
 0x44e   : > { %1961 = vmatpush3.bf16.msra.mxu0 %v2135_v3 }
 0x44f   : > { %1962 = vmatprep.subr.bf16.mxu0 %v2136_v4 }
 0x452   : > { %1963 = vmatpush3.bf16.msra.mxu0 %v2136_v4 }
 0x508   : > { %v1926_v52 = vpop.f32.mrb[8].mxu0 }
 0x509   : > { %v1053_v53 = vpop.f32.mrb[9].mxu0  ;;  %v1070_v56 = vadd.f32 %v1926_v52, %v2714_v18 }
 0x50a   : > { %v1068_v54 = vadd.f32 %v1053_v53, %v2710_v16  ;;  %v1927_v55 = vpop.f32.mrb[10].mxu0 }
 0x50b   : > { %v1071_v58 = vadd.f32 %v1927_v55, %v2708_v15  ;;  %v1056_v59 = vpop.f32.mrb[11].mxu0  ;;  %v1082_v0 = vadd.f32 %v1692_v57, %v1070_v56 }
 0x50c   : > { %v1069_v60 = vadd.f32 %v1056_v59, %v2712_v17  ;;  %v1080_v62 = vadd.f32 %v1692_v57, %v1068_v54 }
 0x50d   : > { %v1083_v61 = vadd.f32 %v1692_v57, %v1071_v58 }
 0x50e   : > { %v1081_v63 = vadd.f32 %v1692_v57, %v1069_v60 }
 0x50f   : > { %v1093_v2 = vpack.c.bf16 %v1083_v61, %v1082_v0 }
 0x510   : > { %v1092_v1 = vpack.c.bf16 %v1081_v63, %v1080_v62 }
 0x512   : > { %1944 = vmatprep.mubr.bf16.mxu1 %v1092_v1 }
 0x513   : > { %1945 = vmatmul.mubr.bf16.vlgmr.msra.gmra.mrb[8].mxu1 %v1093_v2 }
 0x514   : > { %1969 = vmatpush3.bf16.msra.mxu1 %v2137_v5 }
 0x515   : > { %1970 = vmatprep.subr.bf16.mxu1 %v2138_v6 }
 0x518   : > { %1971 = vmatpush3.bf16.msra.mxu1 %v2138_v6 }
 0x519   : > { %1972 = vmatprep.subr.bf16.mxu1 %v2139_v7 }
 0x51c   : > { %1973 = vmatpush3.bf16.msra.mxu1 %v2139_v7 }
 0x51d   : > { %1974 = vmatprep.subr.bf16.mxu1 %v2140_v8 }
 0x520   : > { %1975 = vmatpush3.bf16.msra.mxu1 %v2140_v8 }
 0x521   : > { %1976 = vmatprep.subr.bf16.mxu1 %v2141_v9 }
 0x524   : > { %1977 = vmatpush3.bf16.msra.mxu1 %v2141_v9 }
 0x525   : > { %1978 = vmatprep.subr.bf16.mxu1 %v2142_v10 }
 0x528   : > { %1979 = vmatpush3.bf16.msra.mxu1 %v2142_v10 }
 0x529   : > { %1980 = vmatprep.subr.bf16.mxu1 %v2143_v26 }
 0x52c   : > { %1981 = vmatpush3.bf16.msra.mxu1 %v2143_v26 }
 0x52d   : > { %1982 = vmatprep.subr.bf16.mxu1 %v2144_v27 }
 0x530   : > { %1983 = vmatpush3.bf16.msra.mxu1 %v2144_v27 }
 0x5e6   : > { %v1946_v12 = vpop.f32.mrb[8].mxu1 }
 0x5e7   : > { %v1210_v13 = vadd.f32 %v1946_v12, %v1694_v11  ;;  %v1201_v14 = vpop.f32.mrb[9].mxu1 }
 0x5e8   : > { %v1202_v15 = vadd.f32 %v1694_v11, %v1201_v14  ;;  %v1947_v16 = vpop.f32.mrb[10].mxu1 }
 0x5e9   : > { %v1213_v17 = vadd.f32 %v1947_v16, %v1694_v11  ;;  %v1204_v18 = vpop.f32.mrb[11].mxu1  ;;  %v1218_v20 = vmax.f32 %v1210_v13, 0.0 }
 0x5ea   : > { %v1205_v19 = vadd.f32 %v1694_v11, %v1204_v18  ;;  %v1216_v22 = vmax.f32 %v1202_v15, 0.0 }
 0x5eb   : > { %v1219_v21 = vmax.f32 %v1213_v17, 0.0 }
 0x5ec   : > { %v1217_v23 = vmax.f32 %v1205_v19, 0.0 }
 0x5ed   : > { %v1221_v24 = vpack.c.bf16 %v1219_v21, %v1218_v20 }
 0x5ee   : > { %v1220_v25 = vpack.c.bf16 %v1217_v23, %v1216_v22 }
 0x5f0   : > { %1964 = vmatprep.mubr.bf16.mxu0 %v1220_v25 }
 0x5f1   : > { %1965 = vmatmul.mubr.bf16.vlgmr.msra.gmra.mrb[12].mxu0 %v1221_v24 }
 0x6c4   : > { %v1966_v28 = vpop.f32.mrb[12].mxu0 }
 0x6c5   : > { %v1338_v29 = vadd.f32 %v1966_v28, %v1082_v0  ;;  %v1321_v30 = vpop.f32.mrb[13].mxu0 }
 0x6c6   : > { %v1336_v32 = vadd.f32 %v1321_v30, %v1080_v62  ;;  %v1967_v33 = vpop.f32.mrb[14].mxu0 }
 0x6c7   : > { %v1339_v34 = vadd.f32 %v1967_v33, %v1083_v61  ;;  %v1324_v35 = vpop.f32.mrb[15].mxu0  ;;  %v1350_v37 = vadd.f32 %v1712_v31, %v1338_v29 }
 0x6c8   : > { %v1337_v36 = vadd.f32 %v1324_v35, %v1081_v63  ;;  %v1348_v39 = vadd.f32 %v1712_v31, %v1336_v32 }
 0x6c9   : > { %v1351_v38 = vadd.f32 %v1712_v31, %v1339_v34 }
 0x6ca   : > { %v1349_v40 = vadd.f32 %v1712_v31, %v1337_v36 }
 0x6cb   : > { %v1361_v41 = vpack.c.bf16 %v1351_v38, %v1350_v37 }
 0x6cc   : > { %v1360_v42 = vpack.c.bf16 %v1349_v40, %v1348_v39 }
 0x6ce   : > { %1984 = vmatprep.mubr.bf16.mxu1 %v1360_v42 }
 0x6cf   : > { %1985 = vmatmul.mubr.bf16.vlgmr.msra.gmra.mrb[12].mxu1 %v1361_v41 }
 0x7a2   : > { %v1986_v43 = vpop.f32.mrb[12].mxu1 }
 0x7a3   : > { %v1467_v45 = vpop.f32.mrb[13].mxu1  ;;  %v1476_v47 = vadd.f32 %v1986_v43, %v1713_v44 }
 0x7a4   : > { %v1987_v46 = vpop.f32.mrb[14].mxu1  ;;  %v1468_v50 = vadd.f32 %v1713_v44, %v1467_v45 }
 0x7a5   : > { %v1479_v48 = vadd.f32 %v1987_v46, %v1713_v44  ;;  %v1470_v49 = vpop.f32.mrb[15].mxu1 }
 0x7a6   : > { %v1471_v51 = vadd.f32 %v1713_v44, %v1470_v49 }
 0x7a7   : > { %v1745_v52 = vpack.c.bf16 %v1479_v48, %v1476_v47 }
 0x7a8   : > { %v1740_v53 = vpack.c.bf16 %v1471_v51, %v1468_v50 }
 0x7a9   : > { %1747 = vst [vmem:[%s408_s26 + $0x8] sm:$0xff] %v1745_v52  }
 0x7aa   : > { %1741 = vst [vmem:[%s408_s26] sm:$0xff] %v1740_v53  }
 0x7ab   : > { %2300 = shalt.err (!%p2297_p13)
}
 0x7ac   : > { %s2301_s15 = scalar_lea.hbm %s2747_s16, 256  ;;  %s2305_s26 = scalar_lea.hbm %s2824_s18, 512 }
 0x7ad   : > { %p2302_p9 = scmp.ne.s32.totalorder %s2747_s16, %s2301_s15  ;;  %p2306_p4 = scmp.lt.u32.totalorder %s2747_s16, %s2824_s18 }
 0x7ae   : > { %p2307_p8 = scmp.lt.u32.totalorder %s2305_s26, %s2301_s15  ;;  %p2309_p3 = scmp.lt.u32.totalorder %s2301_s15, %s2747_s16 }
 0x7af   : > { %p2303_p0 = pnand %p2302_p9, %p2594_p10 }
 0x7b0   : > { %p2308_p6 = por %p2307_p8, %p2306_p4 }
 0x7b1   : > { %p2304_p11 = pneg %p2303_p0 }
 0x7b2   : > { %p2310_p5 = por %p2309_p3, %p2308_p6 }
 0x7b4   : > { %p2311_p7 = pnand %p2310_p5, %p2304_p11 }
 0x7b6   : > { %2314 = shalt.err (!%p2311_p7)
}
 0x7b7   : > { %s2371_s29 = smov 64   ;;  %s2372_s21 = smov 4  }
 0x7b8   : > { %2006 = dma.vmem_to_hbm [thread:$0]  (%p2594_p10), %s2742_s19, 256, %s2747_s16, %s1503_s13, %s2371_s29, %s2371_s29, %s2372_s21  }
 0x7b9 PF: > { %s2825_s23 = sld [smem:[#allocation17_spill]]  ;;  %s2826_s24 = sld [smem:[#allocation18_spill]] }
 0x7ba   : > { %p2828_p1 = scmp.ge.s32.totalorder %s2361_s12, 2 }
 0x7bf   : > { %s1531_s9 = sand.u32 1, %s2825_s23   ;;  %p2827_p12 = scmp.ne.s32.totalorder %s2826_s24, 0 }
 0x7c0   : > { %s1532_s15 = scalar_lea.sflag [#allocation5], %s1531_s9 }
 0x7c1   : > { %p2026_p2 = pnand %p2828_p1, %p2827_p12 }
 0x7c3   : > { %2344 = dma.done.wait (!%p2026_p2), %s1532_s15, 256  }
 0x7c4   : > { %2346 = vsyncadd (!%p2026_p2), %s1532_s15, 4294967040  ;;  %p24_p13 = scmp.ge.s32.totalorder %s2584_s14, 4   ;;  %s2829_s30 = smov %s2353_s10 }
 0x7c5   : > { %s2830_s10 = smov %s2357_s11  ;;  %s2831_s11 = smov %s2600_s28 }
 0x7c6   : > { %s2832_s12 = smov %s2584_s14  ;;  %26 = sbr.rel (!%p24_p13) target bundleno = 9 (0x9), region = 125 }
 0x7cd   :  { %1537 = vsyncpa [#allocation4], 1 }
 0x7ce   :  { %1539 = vsyncpa [#allocation4 + $0x1], 1 }
 0x7cf   :  { %1540 = vsyncpa [#allocation7], 1 }
 0x7d0   :  { %1541 = vsyncpa [#allocation10], 1 }
 0x7d1   :  { %1542 = vsyncpa [#allocation5], 1 }
 0x7d2   :  { %1544 = vsyncpa [#allocation5 + $0x1], 1 }

// kernel: tpu_custom_call.1
= control target key start
LH: loop header
LB: loop body
LE: loop exit
PB: predicated region body
PF: predicated region fallthrough
CT: control target
= control target key end

     0   :  { %s2791_s0 = inlined_call_operand.hbm [shape: bf16[64,128], index: 0, kind: input, shape index: {}]   ;;  %s2792_s1 = inlined_call_operand.hbm [shape: bf16[128,128], index: 1, kind: input, shape index: {}]   ;;  %s2793_s2 = inlined_call_operand.vmem [shape: f32[1,128], index: 2, kind: input, shape index: {}]   ;;  %s2794_s3 = inlined_call_operand.hbm [shape: bf16[3,128,128], index: 3, kind: input, shape index: {}]   ;;  %s2795_s4 = inlined_call_operand.vmem [shape: f32[3,1,128], index: 4, kind: input, shape index: {}]   ;;  %s2796_s5 = inlined_call_operand.hbm [shape: bf16[3,128,128], index: 5, kind: input, shape index: {}]   ;;  %s2797_s6 = inlined_call_operand.vmem [shape: f32[3,1,128], index: 6, kind: input, shape index: {}]   ;;  %s2798_s7 = inlined_call_operand.hbm [shape: bf16[128,128], index: 7, kind: input, shape index: {}]   ;;  %s2799_s8 = inlined_call_operand.vmem [shape: f32[1,128], index: 8, kind: input, shape index: {}]   ;;  %s2800_s9 = inlined_call_operand.hbm [shape: bf16[64,128], index: 9, kind: output, shape index: {}]  }
   0x1   :  { %2807 = sst [smem:[#allocation19_spill]] %s2800_s9 }
   0x2   :  { %14 = vsyncpa [#allocation4], 0 }
   0x3   :  { %16 = vsyncpa [#allocation4 + $0x1], 0 }
   0x4   :  { %17 = vsyncpa [#allocation7], 0 }
   0x5   :  { %18 = vsyncpa [#allocation10], 0 }
   0x6   :  { %19 = vsyncpa [#allocation5], 0 }
   0x7   :  { %21 = vsyncpa [#allocation5 + $0x1], 0  ;;  %s2423_s30 = smov 0   ;;  %s2425_s10 = smov 0  }
   0x8   :  { %s2427_s11 = smov 0   ;;  %s2429_s12 = smov 0  }
   0x9 LB: > { %2808 = sst [smem:[#allocation17_spill]] %s2349_s30  ;;  %s2444_s13 = sadd.s32 4294967295, %s2361_s12   ;;  %s2361_s12 = sphi %s2429_s12, %s2832_s12   ;;  %s2357_s11 = sphi %s2427_s11, %s2831_s11   ;;  %s2353_s10 = sphi %s2425_s10, %s2830_s10   ;;  %s2349_s30 = sphi %s2423_s30, %s2829_s30  }
   0xa   : > { %s1627_s14 = sadd.s32 4294967294, %s2361_s12   ;;  %p47_p0 = scmp.ne.s32.totalorder %s2353_s10, %s2349_s30 }
   0xb   : > { %p2801_p1 = scmp.eq.s32.totalorder %s2444_s13, 0  ;;  %p245_p3 = scmp.eq.s32.totalorder %s1627_s14, 1 }
   0xc   : > { %p1628_p5 = scmp.ge.s32.totalorder %s2361_s12, 1  ;;  %p252_p7 = scmp.lt.s32.totalorder %s2361_s12, 3 }
   0xd   : > { %p2453_p4 = por %p2801_p1, %p47_p0  ;;  %p2458_p6 = por %p245_p3, %p47_p0 }
   0xe   : > { %p2463_p8 = pnand %p1628_p5, %p252_p7  ;;  %s2363_s18 = smov [#allocation6]  }
   0xf   : > { %s2809_s15 = scalar_select %p2453_p4, 1, 0 }
  0x10   : > { %s2810_s16 = scalar_select %p2458_p6, 1, 0 }
  0x11   : > { %s2812_s17 = scalar_select %p2463_p8, 1, 0 }
  0x12   : > { %2811 = sst [smem:[#allocation18_spill]] %s2810_s16  ;;  %s264_s19 = sshll.u32 %s2363_s18, 4  ;;  %s2467_s19 = int_to_ptr.vmem [resolvable:$true] %s264_s19 }
  0x13   : > { %p2008_p9 = pneg %p2463_p8  ;;  %s2364_s21 = smov [#allocation9]  }
  0x14   : > { %s296_s22 = sshll.u32 %s2364_s21, 4  ;;  %s2365_s23 = smov [#allocation8]   ;;  %s2478_s22 = int_to_ptr.vmem [resolvable:$true] %s296_s22 }
  0x15   : > { %p2474_p11 = pnand %p2008_p9, %p2801_p1  ;;  %s2480_s24 = sshll.u32 %s2365_s23, 4  ;;  %s281_s24 = int_to_ptr.vmem [resolvable:$true] %s2480_s24 }
  0x16   : > { %s2145_s27 = scalar_lea.hbm %s2792_s1, 1024 }
  0x17   : > { %p2146_p12 = scmp.ne.s32.totalorder %s2792_s1, %s2145_s27  ;;  %p2490_p13 = pneg %p2474_p11 }
  0x18   : > { %p2152_p5 = scmp.lt.u32.totalorder %s2145_s27, %s2792_s1 }
  0x19   : > { %p2148_p0 = pnand %p2490_p13, %p2146_p12 }
  0x1b   : > { %p2149_p3 = pneg %p2148_p0 }
  0x1d   : > { %p2154_p7 = pnand %p2152_p5, %p2149_p3 }
  0x1f   : > { %2157 = shalt.err (!%p2154_p7)
}
  0x20   : > { %s2158_s23 = scalar_lea.vmem %s2467_s19, 1024  ;;  %p2166_p2 = scmp.lt.s32.totalorder %s2467_s19, %s2467_s19 }
  0x21   : > { %p2159_p9 = scmp.ne.s32.totalorder %s2467_s19, %s2158_s23  ;;  %p2167_p6 = scmp.lt.s32.totalorder %s2158_s23, %s2158_s23 }
  0x23   : > { %p2161_p10 = pnand %p2159_p9, %p2490_p13  ;;  %p2168_p12 = por %p2167_p6, %p2166_p2 }
  0x25   : > { %p2162_p1 = pneg %p2161_p10 }
  0x27   : > { %p2169_p0 = pnand %p2168_p12, %p2162_p1 }
  0x29   : > { %2172 = shalt.err (!%p2169_p0)
}
  0x2a   : > { %s2366_s25 = smov 64   ;;  %s2367_s26 = smov 4  }
  0x2b   : > { %2011 = dma.hbm_to_vmem [thread:$0]  (!%p2474_p11), %s2792_s1, 1024, %s2467_s19, [#allocation7], %s2366_s25, %s2366_s25, %s2367_s26  }
  0x2c   : > { %s2173_s21 = scalar_lea.hbm %s2796_s5, 3072 }
  0x2d   : > { %p2174_p1 = scmp.ne.s32.totalorder %s2796_s5, %s2173_s21  ;;  %p2180_p10 = scmp.lt.u32.totalorder %s2173_s21, %s2796_s5 }
  0x2f   : > { %p2176_p2 = pnand %p2174_p1, %p2490_p13 }
  0x31   : > { %p2177_p6 = pneg %p2176_p2 }
  0x33   : > { %p2182_p3 = pnand %p2180_p10, %p2177_p6 }
  0x35   : > { %2185 = shalt.err (!%p2182_p3)
}
  0x36   : > { %s2186_s19 = scalar_lea.vmem %s2478_s22, 3072  ;;  %p2194_p12 = scmp.lt.s32.totalorder %s2478_s22, %s2478_s22 }
  0x37   : > { %p2187_p5 = scmp.ne.s32.totalorder %s2478_s22, %s2186_s19  ;;  %p2195_p0 = scmp.lt.s32.totalorder %s2186_s19, %s2186_s19 }
  0x39   : > { %p2189_p7 = pnand %p2187_p5, %p2490_p13  ;;  %p2196_p1 = por %p2195_p0, %p2194_p12 }
  0x3b   : > { %p2190_p9 = pneg %p2189_p7 }
  0x3d   : > { %p2197_p2 = pnand %p2196_p1, %p2190_p9 }
  0x3f   : > { %2200 = shalt.err (!%p2197_p2)
}
  0x40   : > { %2017 = dma.hbm_to_vmem [thread:$0]  (!%p2474_p11), %s2796_s5, 3072, %s2478_s22, [#allocation10], %s2366_s25, %s2366_s25, %s2367_s26  }
  0x41   : > { %s2201_s28 = scalar_lea.hbm %s2794_s3, 3072 }
  0x42   : > { %p2202_p6 = scmp.ne.s32.totalorder %s2794_s3, %s2201_s28  ;;  %p2208_p5 = scmp.lt.u32.totalorder %s2201_s28, %s2794_s3 }
  0x44   : > { %p2204_p10 = pnand %p2202_p6, %p2490_p13 }
  0x46   : > { %p2205_p3 = pneg %p2204_p10 }
  0x48   : > { %p2210_p7 = pnand %p2208_p5, %p2205_p3 }
  0x4a   : > { %2213 = shalt.err (!%p2210_p7)
}
  0x4b   : > { %s2214_s19 = scalar_lea.vmem %s281_s24, 3072  ;;  %p2222_p1 = scmp.lt.s32.totalorder %s281_s24, %s281_s24 }
  0x4c   : > { %p2215_p9 = scmp.ne.s32.totalorder %s281_s24, %s2214_s19  ;;  %p2223_p2 = scmp.lt.s32.totalorder %s2214_s19, %s2214_s19 }
  0x4e   : > { %p2217_p12 = pnand %p2215_p9, %p2490_p13  ;;  %p2224_p4 = por %p2223_p2, %p2222_p1 }
  0x50   : > { %p2218_p0 = pneg %p2217_p12 }
  0x52   : > { %p2225_p8 = pnand %p2224_p4, %p2218_p0 }
  0x54   : > { %2228 = shalt.err (!%p2225_p8)
}
  0x55   : > { %2014 = dma.hbm_to_vmem [thread:$0]  (!%p2474_p11), %s2794_s3, 3072, %s281_s24, [#allocation7], %s2366_s25, %s2366_s25, %s2367_s26  }
  0x56   : > { %s2368_s30 = smov [#allocation11]   ;;  %s2229_s29 = scalar_lea.hbm %s2798_s7, 1024 }
  0x57   : > { %s312_s16 = sshll.u32 %s2368_s30, 4  ;;  %p2230_p4 = scmp.ne.s32.totalorder %s2798_s7, %s2229_s29  ;;  %s313_s16 = int_to_ptr.vmem [resolvable:$true] %s312_s16 }
  0x58   : > { %p2236_p10 = scmp.lt.u32.totalorder %s2229_s29, %s2798_s7 }
  0x59   : > { %p2232_p8 = pnand %p2230_p4, %p2490_p13 }
  0x5b   : > { %p2233_p6 = pneg %p2232_p8 }
  0x5d   : > { %p2238_p3 = pnand %p2236_p10, %p2233_p6 }
  0x5f   : > { %2241 = shalt.err (!%p2238_p3)
}
  0x60   : > { %s2242_s24 = scalar_lea.vmem %s313_s16, 1024  ;;  %p2250_p12 = scmp.lt.s32.totalorder %s313_s16, %s313_s16 }
  0x61   : > { %p2243_p5 = scmp.ne.s32.totalorder %s313_s16, %s2242_s24  ;;  %p2251_p0 = scmp.lt.s32.totalorder %s2242_s24, %s2242_s24 }
  0x63   : > { %p2245_p7 = pnand %p2243_p5, %p2490_p13  ;;  %p2252_p1 = por %p2251_p0, %p2250_p12 }
  0x65   : > { %p2246_p9 = pneg %p2245_p7 }
  0x67   : > { %p2253_p2 = pnand %p2252_p1, %p2246_p9 }
  0x69   : > { %2256 = shalt.err (!%p2253_p2)
}
  0x6a   : > { %2020 = dma.hbm_to_vmem [thread:$0]  (!%p2474_p11), %s2798_s7, 1024, %s313_s16, [#allocation10], %s2366_s25, %s2366_s25, %s2367_s26  }
  0x6b   : > { %s2584_s14 = sadd.s32 1, %s2361_s12   ;;  %s34_s20 = sadd.s32 1, %s2357_s11 }
  0x6c   : > { %s31_s30 = ssub.s32 %s2361_s12, %s2584_s14  ;;  %p41_p13 = scmp.ne.s32.totalorder %s2357_s11, %s2353_s10 }
  0x6d   : > { %p32_p4 = scmp.eq.s32.totalorder %s31_s30, 0  ;;  %p42_p8 = scmp.eq.s32.totalorder %s2361_s12, 0 }
  0x6e   : > { %p2815_p6 = scmp.eq.s32.totalorder %s2444_s13, 1  ;;  %p2033_p3 = scmp.lt.s32.totalorder %s2361_s12, 2 }
  0x6f   : > { %s2600_s28 = scalar_select %p32_p4, %s2357_s11, %s34_s20  }
  0x70   : > { %p2594_p10 = por %p2815_p6, %p41_p13  ;;  %p43_p5 = por %p42_p8, %p41_p13 }
  0x71   : > { %s329_s29 = sand.u32 1, %s2357_s11   ;;  %s1731_s16 = sshll.u32 %s2361_s12, 8 }
  0x72   : > { %s1634_s18 = sshll.u32 %s329_s29, 4  ;;  %s2607_s19 = scalar_lea.hbm %s2791_s0, %s1731_s16 }
  0x73   : > { %s333_s24 = scalar_lea.vmem [#allocation3], %s1634_s18  ;;  %p2611_p11 = pnand %p2033_p3, %p43_p5 }
  0x74   : > { %s340_s22 = sshll.u32 %s333_s24, 4  ;;  %s2615_s20 = scalar_lea.sflag [#allocation4], %s329_s29  ;;  %s2609_s22 = int_to_ptr.vmem [resolvable:$true] %s340_s22 }
  0x75   : > { %s2257_s30 = scalar_lea.hbm %s2607_s19, 256  ;;  %p2259_p9 = pneg %p2611_p11 }
  0x76   : > { %p2258_p7 = scmp.ne.s32.totalorder %s2607_s19, %s2257_s30  ;;  %s2262_s21 = scalar_lea.hbm %s2791_s0, 512 }
  0x77   : > { %p2263_p1 = scmp.lt.u32.totalorder %s2607_s19, %s2791_s0  ;;  %p2264_p2 = scmp.lt.u32.totalorder %s2262_s21, %s2257_s30 }
  0x78   : > { %p2260_p12 = pnand %p2259_p9, %p2258_p7  ;;  %p2266_p4 = scmp.lt.u32.totalorder %s2257_s30, %s2607_s19 }
  0x79   : > { %p2265_p13 = por %p2264_p2, %p2263_p1 }
  0x7a   : > { %p2261_p0 = pneg %p2260_p12 }
  0x7b   : > { %p2267_p8 = por %p2266_p4, %p2265_p13 }
  0x7d   : > { %p2268_p6 = pnand %p2267_p8, %p2261_p0 }
  0x7f   : > { %2271 = shalt.err (!%p2268_p6)
}
  0x80   : > { %s2272_s29 = scalar_lea.vmem %s2609_s22, 256  ;;  %s2369_s18 = smov [#allocation3]  }
  0x81   : > { %p2273_p3 = scmp.ne.s32.totalorder %s2609_s22, %s2272_s29  ;;  %s2277_s16 = sshll.u32 %s2369_s18, 4  ;;  %s2278_s16 = int_to_ptr.vmem [resolvable:$false] %s2277_s16 }
  0x82   : > { %s2279_s23 = scalar_lea.vmem %s2278_s16, 512  ;;  %p2280_p12 = scmp.lt.s32.totalorder %s2609_s22, %s2278_s16 }
  0x83   : > { %p2275_p5 = pnand %p2273_p3, %p2259_p9  ;;  %p2281_p1 = scmp.lt.s32.totalorder %s2279_s23, %s2272_s29 }
  0x85   : > { %p2276_p7 = pneg %p2275_p5  ;;  %p2282_p2 = por %p2281_p1, %p2280_p12 }
  0x87   : > { %p2283_p13 = pnand %p2282_p2, %p2276_p7 }
  0x89   : > { %2286 = shalt.err (!%p2283_p13)
}
  0x8a   : > { %2024 = dma.hbm_to_vmem [thread:$0]  (!%p2611_p11), %s2607_s19, 256, %s2609_s22, %s2615_s20, %s2366_s25, %s2366_s25, %s2367_s26  }
  0x8b   : > { %p2818_p9 = scmp.ne.s32.totalorder %s2812_s17, 0 }
  0x8c   : > { %s2649_s30 = sand.u32 (!%p2818_p9), 1, %s2353_s10   ;;  %p2819_p0 = scmp.ne.s32.totalorder (!%p2818_p9), %s2809_s15, 0 }
  0x8d   : > { %352 = sbr.rel (%p2818_p9) target bundleno = 1977 (0x7b9), region = 56  ;;  %s1638_s21 = sshll.u32 (!%p2818_p9), %s2649_s30, 4 }
  0x8e   : > { %s355_s24 = scalar_lea.sflag (!%p2818_p9), [#allocation4], %s2649_s30  ;;  %s2655_s9 = scalar_lea.vmem (!%p2818_p9), [#allocation3], %s1638_s21 }
  0x94   : > { %2332 = dma.done.wait (%p2819_p0), %s355_s24, 256  }
  0x95   : > { %2334 = vsyncadd (%p2819_p0), %s355_s24, 4294967040  ;;  %p2820_p11 = scmp.eq.s32.totalorder %s2444_s13, 0 }
  0x97   : > { %2336 = dma.done.wait (%p2820_p11), [#allocation7], 4096   ;;  %p2821_p4 = pmov %p2820_p11 }
  0x99   : > { %2338 = vsyncadd (%p2821_p4), [#allocation7], 4294963200  ;;  %p2822_p8 = pmov %p2821_p4 }
  0x9a   : > { %p2823_p6 = pmov %p2821_p4 }
  0x9b   : > { %2340 = dma.done.wait (%p2822_p8), [#allocation10], 4096  }
  0x9c   : > { %2342 = vsyncadd (%p2823_p6), [#allocation10], 4294963200  ;;  %v2079_v0 = vld [vmem:[#allocation6] sm:$0xff]   ;;  %v2080_v1 = vld [vmem:[#allocation6 + $0x8] sm:$0xff]   ;;  %s408_s26 = scalar_lea.vmem [#allocation12], %s1638_s21  ;;  %s1736_s22 = sshll.u32 %s2444_s13, 8 }
  0x9d   : > { %1828 = vmatprep.subr.bf16.mxu0 %v2079_v0  ;;  %v2081_v2 = vld [vmem:[#allocation6 + $0x10] sm:$0xff]   ;;  %v2082_v3 = vld [vmem:[#allocation6 + $0x18] sm:$0xff]   ;;  %v2089_v5 = vld [vmem:[#allocation8] sm:$0xff]   ;;  %s1516_s19 = sshll.u32 %s408_s26, 4  ;;  %s2824_s18 = sld [smem:[#allocation19_spill]]  ;;  %s2742_s19 = int_to_ptr.vmem [resolvable:$true] %s1516_s19 }
  0x9e   : > { %1829 = vmatpush3.bf16.msra.mxu0 %v2079_v0  ;;  %v2087_v4 = vld [vmem:[%s2655_s9] sm:$0xff]   ;;  %v2090_v6 = vld [vmem:[#allocation8 + $0x8] sm:$0xff]   ;;  %1848 = vmatprep.subr.bf16.mxu1 %v2089_v5  ;;  %v2092_v10 = vld [vmem:[#allocation8 + $0x18] sm:$0xff]   ;;  %s1503_s13 = scalar_lea.sflag [#allocation5], %s2649_s30  ;;  %s2287_s21 = scalar_lea.vmem %s2742_s19, 256 }
  0x9f   : > { %1830 = vmatprep.subr.bf16.mxu0 %v2080_v1  ;;  %1844 = vmatprep.mubr.bf16.mxu0 %v2087_v4  ;;  %v2083_v7 = vld [vmem:[#allocation6 + $0x20] sm:$0xff]   ;;  %v2091_v8 = vld [vmem:[#allocation8 + $0x10] sm:$0xff]   ;;  %v2084_v9 = vld [vmem:[#allocation6 + $0x28] sm:$0xff]   ;;  %p2288_p3 = scmp.ne.s32.totalorder %s2742_s19, %s2287_s21  ;;  %s2370_s23 = smov [#allocation12]  }
  0xa0   : > { %1849 = vmatpush3.bf16.msra.mxu1 %v2089_v5  ;;  %v2085_v11 = vld [vmem:[#allocation6 + $0x30] sm:$0xff]   ;;  %v2093_v12 = vld [vmem:[#allocation8 + $0x20] sm:$0xff]   ;;  %v2086_v13 = vld [vmem:[#allocation6 + $0x38] sm:$0xff]   ;;  %s2291_s24 = sshll.u32 %s2370_s23, 4  ;;  %s2292_s24 = int_to_ptr.vmem [resolvable:$false] %s2291_s24 }
  0xa1   : > { %1850 = vmatprep.subr.bf16.mxu1 %v2090_v6  ;;  %v2094_v14 = vld [vmem:[#allocation8 + $0x28] sm:$0xff]   ;;  %v2095_v16 = vld [vmem:[#allocation8 + $0x30] sm:$0xff]   ;;  %v2096_v17 = vld [vmem:[#allocation8 + $0x38] sm:$0xff]   ;;  %p2289_p5 = pnand %p2288_p3, %p2594_p10  ;;  %p2294_p12 = scmp.lt.s32.totalorder %s2742_s19, %s2292_s24 }
  0xa2   : > { %1831 = vmatpush3.bf16.msra.mxu0 %v2080_v1  ;;  %v2088_v15 = vld [vmem:[%s2655_s9 + $0x8] sm:$0xff]   ;;  %v2097_v18 = vld [vmem:[#allocation9] sm:$0xff]   ;;  %v2099_v20 = vld [vmem:[#allocation9 + $0x10] sm:$0xff]   ;;  %s2293_s9 = scalar_lea.vmem %s2292_s24, 512 }
  0xa3   : > { %1832 = vmatprep.subr.bf16.mxu0 %v2081_v2  ;;  %v2098_v19 = vld [vmem:[#allocation9 + $0x8] sm:$0xff]   ;;  %v2100_v21 = vld [vmem:[#allocation9 + $0x18] sm:$0xff]   ;;  %v2101_v22 = vld [vmem:[#allocation9 + $0x20] sm:$0xff]   ;;  %s2747_s16 = scalar_lea.hbm %s2824_s18, %s1736_s22  ;;  %p2290_p7 = pneg %p2289_p5 }
  0xa4   : > { %1851 = vmatpush3.bf16.msra.mxu1 %v2090_v6  ;;  %v2102_v23 = vld [vmem:[#allocation9 + $0x28] sm:$0xff]   ;;  %v1644_v24 = vld [vmem:[%s2793_s2] ss:$0 sm:$0xff]  ;;  %v2103_v39 = vld [vmem:[#allocation9 + $0x30] sm:$0xff]   ;;  %p2295_p1 = scmp.lt.s32.totalorder %s2293_s9, %s2287_s21 }
  0xa5   : > { %1852 = vmatprep.subr.bf16.mxu1 %v2091_v8  ;;  %v2104_v40 = vld [vmem:[#allocation9 + $0x38] sm:$0xff]   ;;  %v2105_v41 = vld [vmem:[#allocation8 + $0x40] sm:$0xff]   ;;  %v2106_v42 = vld [vmem:[#allocation8 + $0x48] sm:$0xff]  }
  0xa6   : > { %1833 = vmatpush3.bf16.msra.mxu0 %v2081_v2  ;;  %v2107_v43 = vld [vmem:[#allocation8 + $0x50] sm:$0xff]   ;;  %v2108_v44 = vld [vmem:[#allocation8 + $0x58] sm:$0xff]   ;;  %v2109_v45 = vld [vmem:[#allocation8 + $0x60] sm:$0xff]   ;;  %p2296_p2 = por %p2295_p1, %p2294_p12 }
  0xa7   : > { %1834 = vmatprep.subr.bf16.mxu0 %v2082_v3  ;;  %v2110_v46 = vld [vmem:[#allocation8 + $0x68] sm:$0xff]   ;;  %v1655_v47 = vld [vmem:[%s2795_s4] ss:$0 sm:$0xff]  ;;  %v2111_v62 = vld [vmem:[#allocation8 + $0x70] sm:$0xff]  }
  0xa8   : > { %1853 = vmatpush3.bf16.msra.mxu1 %v2091_v8  ;;  %v2112_v63 = vld [vmem:[#allocation8 + $0x78] sm:$0xff]   ;;  %v2113_v0 = vld [vmem:[#allocation9 + $0x40] sm:$0xff]   ;;  %v2114_v1 = vld [vmem:[#allocation9 + $0x48] sm:$0xff]   ;;  %p2297_p13 = pnand %p2296_p2, %p2290_p7 }
  0xa9   : > { %1854 = vmatprep.subr.bf16.mxu1 %v2092_v10  ;;  %v2115_v2 = vld [vmem:[#allocation9 + $0x50] sm:$0xff]   ;;  %v2117_v4 = vld [vmem:[#allocation9 + $0x60] sm:$0xff]   ;;  %v2118_v5 = vld [vmem:[#allocation9 + $0x68] sm:$0xff]  }
  0xaa   : > { %1835 = vmatpush3.bf16.msra.mxu0 %v2082_v3  ;;  %v2116_v3 = vld [vmem:[#allocation9 + $0x58] sm:$0xff]  }
  0xab   : > { %1836 = vmatprep.subr.bf16.mxu0 %v2083_v7 }
  0xac   : > { %1855 = vmatpush3.bf16.msra.mxu1 %v2092_v10 }
  0xad   : > { %1856 = vmatprep.subr.bf16.mxu1 %v2093_v12 }
  0xae   : > { %1837 = vmatpush3.bf16.msra.mxu0 %v2083_v7 }
  0xaf   : > { %1838 = vmatprep.subr.bf16.mxu0 %v2084_v9 }
  0xb0   : > { %1857 = vmatpush3.bf16.msra.mxu1 %v2093_v12 }
  0xb1   : > { %1858 = vmatprep.subr.bf16.mxu1 %v2094_v14 }
  0xb2   : > { %1839 = vmatpush3.bf16.msra.mxu0 %v2084_v9 }
  0xb3   : > { %1840 = vmatprep.subr.bf16.mxu0 %v2085_v11 }
  0xb4   : > { %1859 = vmatpush3.bf16.msra.mxu1 %v2094_v14 }
  0xb5   : > { %1860 = vmatprep.subr.bf16.mxu1 %v2095_v16 }
  0xb6   : > { %1841 = vmatpush3.bf16.msra.mxu0 %v2085_v11  ;;  %v1672_v11 = vld [vmem:[%s2797_s6] ss:$0 sm:$0xff] }
  0xb7   : > { %1842 = vmatprep.subr.bf16.mxu0 %v2086_v13 }
  0xb8   : > { %1861 = vmatpush3.bf16.msra.mxu1 %v2095_v16 }
  0xb9   : > { %1862 = vmatprep.subr.bf16.mxu1 %v2096_v17 }
  0xba   : > { %1843 = vmatpush3.bf16.msra.mxu0 %v2086_v13 }
  0xbb   : > { %1868 = vmatprep.subr.bf16.mxu0 %v2097_v18 }
  0xbc   : > { %1863 = vmatpush3.bf16.msra.mxu1 %v2096_v17 }
  0xbd   : > { %1845 = vmatmul.mubr.bf16.vlgmr.msra.gmra.mrb[0].mxu0 %v2088_v15  ;;  %1888 = vmatprep.subr.bf16.mxu1 %v2105_v41 }
  0xbe   : > { %1869 = vmatpush3.bf16.msra.mxu0 %v2097_v18 }
  0xbf   : > { %1870 = vmatprep.subr.bf16.mxu0 %v2098_v19 }
  0xc2   : > { %1871 = vmatpush3.bf16.msra.mxu0 %v2098_v19 }
  0xc3   : > { %1872 = vmatprep.subr.bf16.mxu0 %v2099_v20 }
  0xc6   : > { %1873 = vmatpush3.bf16.msra.mxu0 %v2099_v20 }
  0xc7   : > { %1874 = vmatprep.subr.bf16.mxu0 %v2100_v21 }
  0xca   : > { %1875 = vmatpush3.bf16.msra.mxu0 %v2100_v21  ;;  %v2119_v21 = vld [vmem:[#allocation9 + $0x70] sm:$0xff]  }
  0xcb   : > { %1876 = vmatprep.subr.bf16.mxu0 %v2101_v22 }
  0xce   : > { %1877 = vmatpush3.bf16.msra.mxu0 %v2101_v22  ;;  %v2120_v22 = vld [vmem:[#allocation9 + $0x78] sm:$0xff]  }
  0xcf   : > { %1878 = vmatprep.subr.bf16.mxu0 %v2102_v23 }
  0xd2   : > { %1879 = vmatpush3.bf16.msra.mxu0 %v2102_v23  ;;  %v2121_v23 = vld [vmem:[#allocation8 + $0x80] sm:$0xff]  }
  0xd3   : > { %1880 = vmatprep.subr.bf16.mxu0 %v2103_v39 }
  0xd6   : > { %1881 = vmatpush3.bf16.msra.mxu0 %v2103_v39 }
  0xd7   : > { %1882 = vmatprep.subr.bf16.mxu0 %v2104_v40 }
  0xda   : > { %1883 = vmatpush3.bf16.msra.mxu0 %v2104_v40 }
  0xdb   : > { %1908 = vmatprep.subr.bf16.mxu0 %v2113_v0 }
 0x190   : > { %v1846_v25 = vpop.f32.mrb[0].mxu0 }
 0x191   : > { %v533_v26 = vpop.f32.mrb[1].mxu0  ;;  %v2676_v29 = vadd.f32 %v1846_v25, %v1644_v24  ;;  %v2123_v25 = vld [vmem:[#allocation8 + $0x90] sm:$0xff]  }
 0x192   : > { %v2674_v27 = vadd.f32 %v1644_v24, %v533_v26  ;;  %v1847_v28 = vpop.f32.mrb[2].mxu0  ;;  %v2124_v26 = vld [vmem:[#allocation8 + $0x98] sm:$0xff]  }
 0x193   : > { %v2678_v30 = vadd.f32 %v1847_v28, %v1644_v24  ;;  %v536_v31 = vpop.f32.mrb[3].mxu0  ;;  %v550_v36 = vmax.f32 %v2676_v29, 0.0  ;;  %v2126_v28 = vld [vmem:[#allocation8 + $0xa8] sm:$0xff]   ;;  %v1674_v29 = vld [vmem:[%s2795_s4 + $0x1] ss:$0 sm:$0xff] }
 0x194   : > { %v2680_v32 = vadd.f32 %v1644_v24, %v536_v31  ;;  %v548_v34 = vmax.f32 %v2674_v27, 0.0  ;;  %v2122_v24 = vld [vmem:[#allocation8 + $0x88] sm:$0xff]   ;;  %v2125_v27 = vld [vmem:[#allocation8 + $0xa0] sm:$0xff]  }
 0x195   : > { %v551_v33 = vmax.f32 %v2678_v30, 0.0 }
 0x196   : > { %v549_v35 = vmax.f32 %v2680_v32, 0.0 }
 0x197   : > { %v561_v38 = vpack.c.bf16 %v551_v33, %v550_v36 }
 0x198   : > { %v560_v37 = vpack.c.bf16 %v549_v35, %v548_v34 }
 0x19a   : > { %1864 = vmatprep.mubr.bf16.mxu1 %v560_v37 }
 0x19b   : > { %1865 = vmatmul.mubr.bf16.vlgmr.msra.gmra.mrb[0].mxu1 %v561_v38 }
 0x19c   : > { %1889 = vmatpush3.bf16.msra.mxu1 %v2105_v41 }
 0x19d   : > { %1890 = vmatprep.subr.bf16.mxu1 %v2106_v42 }
 0x1a0   : > { %1891 = vmatpush3.bf16.msra.mxu1 %v2106_v42 }
 0x1a1   : > { %1892 = vmatprep.subr.bf16.mxu1 %v2107_v43 }
 0x1a4   : > { %1893 = vmatpush3.bf16.msra.mxu1 %v2107_v43 }
 0x1a5   : > { %1894 = vmatprep.subr.bf16.mxu1 %v2108_v44 }
 0x1a8   : > { %1895 = vmatpush3.bf16.msra.mxu1 %v2108_v44  ;;  %v2127_v44 = vld [vmem:[#allocation8 + $0xb0] sm:$0xff]  }
 0x1a9   : > { %1896 = vmatprep.subr.bf16.mxu1 %v2109_v45 }
 0x1ac   : > { %1897 = vmatpush3.bf16.msra.mxu1 %v2109_v45  ;;  %v2128_v45 = vld [vmem:[#allocation8 + $0xb8] sm:$0xff]  }
 0x1ad   : > { %1898 = vmatprep.subr.bf16.mxu1 %v2110_v46 }
 0x1b0   : > { %1899 = vmatpush3.bf16.msra.mxu1 %v2110_v46  ;;  %v2129_v46 = vld [vmem:[#allocation9 + $0x80] sm:$0xff]  }
 0x1b1   : > { %1900 = vmatprep.subr.bf16.mxu1 %v2111_v62 }
 0x1b4   : > { %1901 = vmatpush3.bf16.msra.mxu1 %v2111_v62 }
 0x1b5   : > { %1902 = vmatprep.subr.bf16.mxu1 %v2112_v63 }
 0x1b8   : > { %1903 = vmatpush3.bf16.msra.mxu1 %v2112_v63 }
 0x1b9   : > { %1928 = vmatprep.subr.bf16.mxu1 %v2121_v23 }
 0x26e   : > { %v1866_v48 = vpop.f32.mrb[0].mxu1 }
 0x26f   : > { %v676_v49 = vadd.f32 %v1866_v48, %v1655_v47  ;;  %v667_v50 = vpop.f32.mrb[1].mxu1  ;;  %v2131_v48 = vld [vmem:[#allocation9 + $0x90] sm:$0xff]  }
 0x270   : > { %v668_v51 = vadd.f32 %v1655_v47, %v667_v50  ;;  %v1867_v52 = vpop.f32.mrb[2].mxu1  ;;  %v2133_v50 = vld [vmem:[#allocation9 + $0xa0] sm:$0xff]  }
 0x271   : > { %v679_v53 = vadd.f32 %v1867_v52, %v1655_v47  ;;  %v670_v54 = vpop.f32.mrb[3].mxu1  ;;  %v684_v56 = vmax.f32 %v676_v49, 0.0  ;;  %v2132_v49 = vld [vmem:[#allocation9 + $0x98] sm:$0xff]  }
 0x272   : > { %v671_v55 = vadd.f32 %v1655_v47, %v670_v54  ;;  %v682_v58 = vmax.f32 %v668_v51, 0.0  ;;  %v2130_v47 = vld [vmem:[#allocation9 + $0x88] sm:$0xff]  }
 0x273   : > { %v685_v57 = vmax.f32 %v679_v53, 0.0  ;;  %v2134_v51 = vld [vmem:[#allocation9 + $0xa8] sm:$0xff]  }
 0x274   : > { %v683_v59 = vmax.f32 %v671_v55, 0.0 }
 0x275   : > { %v687_v60 = vpack.c.bf16 %v685_v57, %v684_v56  ;;  %v1692_v57 = vld [vmem:[%s2797_s6 + $0x1] ss:$0 sm:$0xff] }
 0x276   : > { %v686_v61 = vpack.c.bf16 %v683_v59, %v682_v58 }
 0x278   : > { %1884 = vmatprep.mubr.bf16.mxu0 %v686_v61 }
 0x279   : > { %1885 = vmatmul.mubr.bf16.vlgmr.msra.gmra.mrb[4].mxu0 %v687_v60 }
 0x27a   : > { %1909 = vmatpush3.bf16.msra.mxu0 %v2113_v0 }
 0x27b   : > { %1910 = vmatprep.subr.bf16.mxu0 %v2114_v1 }
 0x27e   : > { %1911 = vmatpush3.bf16.msra.mxu0 %v2114_v1 }
 0x27f   : > { %1912 = vmatprep.subr.bf16.mxu0 %v2115_v2 }
 0x282   : > { %1913 = vmatpush3.bf16.msra.mxu0 %v2115_v2 }
 0x283   : > { %1914 = vmatprep.subr.bf16.mxu0 %v2116_v3 }
 0x286   : > { %1915 = vmatpush3.bf16.msra.mxu0 %v2116_v3  ;;  %v2135_v3 = vld [vmem:[#allocation9 + $0xb0] sm:$0xff]  }
 0x287   : > { %1916 = vmatprep.subr.bf16.mxu0 %v2117_v4 }
 0x28a   : > { %1917 = vmatpush3.bf16.msra.mxu0 %v2117_v4  ;;  %v2136_v4 = vld [vmem:[#allocation9 + $0xb8] sm:$0xff]  }
 0x28b   : > { %1918 = vmatprep.subr.bf16.mxu0 %v2118_v5 }
 0x28e   : > { %1919 = vmatpush3.bf16.msra.mxu0 %v2118_v5  ;;  %v2137_v5 = vld [vmem:[#allocation11] sm:$0xff]  }
 0x28f   : > { %1920 = vmatprep.subr.bf16.mxu0 %v2119_v21 }
 0x292   : > { %1921 = vmatpush3.bf16.msra.mxu0 %v2119_v21 }
 0x293   : > { %1922 = vmatprep.subr.bf16.mxu0 %v2120_v22 }
 0x296   : > { %1923 = vmatpush3.bf16.msra.mxu0 %v2120_v22 }
 0x297   : > { %1948 = vmatprep.subr.bf16.mxu0 %v2129_v46 }
 0x34c   : > { %v1886_v6 = vpop.f32.mrb[4].mxu0 }
 0x34d   : > { %v786_v7 = vpop.f32.mrb[5].mxu0  ;;  %v803_v10 = vadd.f32 %v1886_v6, %v550_v36  ;;  %v2138_v6 = vld [vmem:[#allocation11 + $0x8] sm:$0xff]  }
 0x34e   : > { %v801_v8 = vadd.f32 %v786_v7, %v548_v34  ;;  %v1887_v9 = vpop.f32.mrb[6].mxu0  ;;  %v2139_v7 = vld [vmem:[#allocation11 + $0x10] sm:$0xff]  }
 0x34f   : > { %v804_v12 = vadd.f32 %v1887_v9, %v551_v33  ;;  %v789_v13 = vpop.f32.mrb[7].mxu0  ;;  %v2714_v18 = vadd.f32 %v1672_v11, %v803_v10  ;;  %v2141_v9 = vld [vmem:[#allocation11 + $0x20] sm:$0xff]   ;;  %v2142_v10 = vld [vmem:[#allocation11 + $0x28] sm:$0xff]  }
 0x350   : > { %v802_v14 = vadd.f32 %v789_v13, %v549_v35  ;;  %v2710_v16 = vadd.f32 %v1672_v11, %v801_v8  ;;  %v2140_v8 = vld [vmem:[#allocation11 + $0x18] sm:$0xff]  }
 0x351   : > { %v2708_v15 = vadd.f32 %v1672_v11, %v804_v12 }
 0x352   : > { %v2712_v17 = vadd.f32 %v1672_v11, %v802_v14  ;;  %v1694_v11 = vld [vmem:[%s2795_s4 + $0x2] ss:$0 sm:$0xff] }
 0x353   : > { %v825_v20 = vpack.c.bf16 %v2708_v15, %v2714_v18 }
 0x354   : > { %v824_v19 = vpack.c.bf16 %v2712_v17, %v2710_v16 }
 0x356   : > { %1904 = vmatprep.mubr.bf16.mxu1 %v824_v19 }
 0x357   : > { %1905 = vmatmul.mubr.bf16.vlgmr.msra.gmra.mrb[4].mxu1 %v825_v20 }
 0x358   : > { %1929 = vmatpush3.bf16.msra.mxu1 %v2121_v23 }
 0x359   : > { %1930 = vmatprep.subr.bf16.mxu1 %v2122_v24 }
 0x35c   : > { %1931 = vmatpush3.bf16.msra.mxu1 %v2122_v24 }
 0x35d   : > { %1932 = vmatprep.subr.bf16.mxu1 %v2123_v25 }
 0x360   : > { %1933 = vmatpush3.bf16.msra.mxu1 %v2123_v25 }
 0x361   : > { %1934 = vmatprep.subr.bf16.mxu1 %v2124_v26 }
 0x364   : > { %1935 = vmatpush3.bf16.msra.mxu1 %v2124_v26  ;;  %v2143_v26 = vld [vmem:[#allocation11 + $0x30] sm:$0xff]  }
 0x365   : > { %1936 = vmatprep.subr.bf16.mxu1 %v2125_v27 }
 0x368   : > { %1937 = vmatpush3.bf16.msra.mxu1 %v2125_v27  ;;  %v2144_v27 = vld [vmem:[#allocation11 + $0x38] sm:$0xff]  }
 0x369   : > { %1938 = vmatprep.subr.bf16.mxu1 %v2126_v28 }
 0x36c   : > { %1939 = vmatpush3.bf16.msra.mxu1 %v2126_v28 }
 0x36d   : > { %1940 = vmatprep.subr.bf16.mxu1 %v2127_v44 }
 0x370   : > { %1941 = vmatpush3.bf16.msra.mxu1 %v2127_v44  ;;  %v1713_v44 = vld [vmem:[%s2799_s8] ss:$0 sm:$0xff] }
 0x371   : > { %1942 = vmatprep.subr.bf16.mxu1 %v2128_v45 }
 0x374   : > { %1943 = vmatpush3.bf16.msra.mxu1 %v2128_v45 }
 0x375   : > { %1968 = vmatprep.subr.bf16.mxu1 %v2137_v5 }
 0x42a   : > { %v1906_v30 = vpop.f32.mrb[4].mxu1 }
 0x42b   : > { %v942_v31 = vadd.f32 %v1906_v30, %v1674_v29  ;;  %v933_v32 = vpop.f32.mrb[5].mxu1 }
 0x42c   : > { %v934_v33 = vadd.f32 %v1674_v29, %v933_v32  ;;  %v1907_v34 = vpop.f32.mrb[6].mxu1 }
 0x42d   : > { %v945_v35 = vadd.f32 %v1907_v34, %v1674_v29  ;;  %v936_v36 = vpop.f32.mrb[7].mxu1  ;;  %v950_v38 = vmax.f32 %v942_v31, 0.0  ;;  %v1712_v31 = vld [vmem:[%s2797_s6 + $0x2] ss:$0 sm:$0xff] }
 0x42e   : > { %v937_v37 = vadd.f32 %v1674_v29, %v936_v36  ;;  %v948_v40 = vmax.f32 %v934_v33, 0.0 }
 0x42f   : > { %v951_v39 = vmax.f32 %v945_v35, 0.0 }
 0x430   : > { %v949_v41 = vmax.f32 %v937_v37, 0.0 }
 0x431   : > { %v953_v42 = vpack.c.bf16 %v951_v39, %v950_v38 }
 0x432   : > { %v952_v43 = vpack.c.bf16 %v949_v41, %v948_v40 }
 0x434   : > { %1924 = vmatprep.mubr.bf16.mxu0 %v952_v43 }
 0x435   : > { %1925 = vmatmul.mubr.bf16.vlgmr.msra.gmra.mrb[8].mxu0 %v953_v42 }
 0x436   : > { %1949 = vmatpush3.bf16.msra.mxu0 %v2129_v46 }
 0x437   : > { %1950 = vmatprep.subr.bf16.mxu0 %v2130_v47 }
 0x43a   : > { %1951 = vmatpush3.bf16.msra.mxu0 %v2130_v47 }
 0x43b   : > { %1952 = vmatprep.subr.bf16.mxu0 %v2131_v48 }
 0x43e   : > { %1953 = vmatpush3.bf16.msra.mxu0 %v2131_v48 }
 0x43f   : > { %1954 = vmatprep.subr.bf16.mxu0 %v2132_v49 }
 0x442   : > { %1955 = vmatpush3.bf16.msra.mxu0 %v2132_v49 }
 0x443   : > { %1956 = vmatprep.subr.bf16.mxu0 %v2133_v50 }
 0x446   : > { %1957 = vmatpush3.bf16.msra.mxu0 %v2133_v50 }
 0x447   : > { %1958 = vmatprep.subr.bf16.mxu0 %v2134_v51 }
 0x44a   : > { %1959 = vmatpush3.bf16.msra.mxu0 %v2134_v51 }
 0x44b   : > { %1960 = vmatprep.subr.bf16.mxu0 %v2135_v3 }
 0x44e   : > { %1961 = vmatpush3.bf16.msra.mxu0 %v2135_v3 }
 0x44f   : > { %1962 = vmatprep.subr.bf16.mxu0 %v2136_v4 }
 0x452   : > { %1963 = vmatpush3.bf16.msra.mxu0 %v2136_v4 }
 0x508   : > { %v1926_v52 = vpop.f32.mrb[8].mxu0 }
 0x509   : > { %v1053_v53 = vpop.f32.mrb[9].mxu0  ;;  %v1070_v56 = vadd.f32 %v1926_v52, %v2714_v18 }
 0x50a   : > { %v1068_v54 = vadd.f32 %v1053_v53, %v2710_v16  ;;  %v1927_v55 = vpop.f32.mrb[10].mxu0 }
 0x50b   : > { %v1071_v58 = vadd.f32 %v1927_v55, %v2708_v15  ;;  %v1056_v59 = vpop.f32.mrb[11].mxu0  ;;  %v1082_v0 = vadd.f32 %v1692_v57, %v1070_v56 }
 0x50c   : > { %v1069_v60 = vadd.f32 %v1056_v59, %v2712_v17  ;;  %v1080_v62 = vadd.f32 %v1692_v57, %v1068_v54 }
 0x50d   : > { %v1083_v61 = vadd.f32 %v1692_v57, %v1071_v58 }
 0x50e   : > { %v1081_v63 = vadd.f32 %v1692_v57, %v1069_v60 }
 0x50f   : > { %v1093_v2 = vpack.c.bf16 %v1083_v61, %v1082_v0 }
 0x510   : > { %v1092_v1 = vpack.c.bf16 %v1081_v63, %v1080_v62 }
 0x512   : > { %1944 = vmatprep.mubr.bf16.mxu1 %v1092_v1 }
 0x513   : > { %1945 = vmatmul.mubr.bf16.vlgmr.msra.gmra.mrb[8].mxu1 %v1093_v2 }
 0x514   : > { %1969 = vmatpush3.bf16.msra.mxu1 %v2137_v5 }
 0x515   : > { %1970 = vmatprep.subr.bf16.mxu1 %v2138_v6 }
 0x518   : > { %1971 = vmatpush3.bf16.msra.mxu1 %v2138_v6 }
 0x519   : > { %1972 = vmatprep.subr.bf16.mxu1 %v2139_v7 }
 0x51c   : > { %1973 = vmatpush3.bf16.msra.mxu1 %v2139_v7 }
 0x51d   : > { %1974 = vmatprep.subr.bf16.mxu1 %v2140_v8 }
 0x520   : > { %1975 = vmatpush3.bf16.msra.mxu1 %v2140_v8 }
 0x521   : > { %1976 = vmatprep.subr.bf16.mxu1 %v2141_v9 }
 0x524   : > { %1977 = vmatpush3.bf16.msra.mxu1 %v2141_v9 }
 0x525   : > { %1978 = vmatprep.subr.bf16.mxu1 %v2142_v10 }
 0x528   : > { %1979 = vmatpush3.bf16.msra.mxu1 %v2142_v10 }
 0x529   : > { %1980 = vmatprep.subr.bf16.mxu1 %v2143_v26 }
 0x52c   : > { %1981 = vmatpush3.bf16.msra.mxu1 %v2143_v26 }
 0x52d   : > { %1982 = vmatprep.subr.bf16.mxu1 %v2144_v27 }
 0x530   : > { %1983 = vmatpush3.bf16.msra.mxu1 %v2144_v27 }
 0x5e6   : > { %v1946_v12 = vpop.f32.mrb[8].mxu1 }
 0x5e7   : > { %v1210_v13 = vadd.f32 %v1946_v12, %v1694_v11  ;;  %v1201_v14 = vpop.f32.mrb[9].mxu1 }
 0x5e8   : > { %v1202_v15 = vadd.f32 %v1694_v11, %v1201_v14  ;;  %v1947_v16 = vpop.f32.mrb[10].mxu1 }
 0x5e9   : > { %v1213_v17 = vadd.f32 %v1947_v16, %v1694_v11  ;;  %v1204_v18 = vpop.f32.mrb[11].mxu1  ;;  %v1218_v20 = vmax.f32 %v1210_v13, 0.0 }
 0x5ea   : > { %v1205_v19 = vadd.f32 %v1694_v11, %v1204_v18  ;;  %v1216_v22 = vmax.f32 %v1202_v15, 0.0 }
 0x5eb   : > { %v1219_v21 = vmax.f32 %v1213_v17, 0.0 }
 0x5ec   : > { %v1217_v23 = vmax.f32 %v1205_v19, 0.0 }
 0x5ed   : > { %v1221_v24 = vpack.c.bf16 %v1219_v21, %v1218_v20 }
 0x5ee   : > { %v1220_v25 = vpack.c.bf16 %v1217_v23, %v1216_v22 }
 0x5f0   : > { %1964 = vmatprep.mubr.bf16.mxu0 %v1220_v25 }
 0x5f1   : > { %1965 = vmatmul.mubr.bf16.vlgmr.msra.gmra.mrb[12].mxu0 %v1221_v24 }
 0x6c4   : > { %v1966_v28 = vpop.f32.mrb[12].mxu0 }
 0x6c5   : > { %v1338_v29 = vadd.f32 %v1966_v28, %v1082_v0  ;;  %v1321_v30 = vpop.f32.mrb[13].mxu0 }
 0x6c6   : > { %v1336_v32 = vadd.f32 %v1321_v30, %v1080_v62  ;;  %v1967_v33 = vpop.f32.mrb[14].mxu0 }
 0x6c7   : > { %v1339_v34 = vadd.f32 %v1967_v33, %v1083_v61  ;;  %v1324_v35 = vpop.f32.mrb[15].mxu0  ;;  %v1350_v37 = vadd.f32 %v1712_v31, %v1338_v29 }
 0x6c8   : > { %v1337_v36 = vadd.f32 %v1324_v35, %v1081_v63  ;;  %v1348_v39 = vadd.f32 %v1712_v31, %v1336_v32 }
 0x6c9   : > { %v1351_v38 = vadd.f32 %v1712_v31, %v1339_v34 }
 0x6ca   : > { %v1349_v40 = vadd.f32 %v1712_v31, %v1337_v36 }
 0x6cb   : > { %v1361_v41 = vpack.c.bf16 %v1351_v38, %v1350_v37 }
 0x6cc   : > { %v1360_v42 = vpack.c.bf16 %v1349_v40, %v1348_v39 }
 0x6ce   : > { %1984 = vmatprep.mubr.bf16.mxu1 %v1360_v42 }
 0x6cf   : > { %1985 = vmatmul.mubr.bf16.vlgmr.msra.gmra.mrb[12].mxu1 %v1361_v41 }
 0x7a2   : > { %v1986_v43 = vpop.f32.mrb[12].mxu1 }
 0x7a3   : > { %v1467_v45 = vpop.f32.mrb[13].mxu1  ;;  %v1476_v47 = vadd.f32 %v1986_v43, %v1713_v44 }
 0x7a4   : > { %v1987_v46 = vpop.f32.mrb[14].mxu1  ;;  %v1468_v50 = vadd.f32 %v1713_v44, %v1467_v45 }
 0x7a5   : > { %v1479_v48 = vadd.f32 %v1987_v46, %v1713_v44  ;;  %v1470_v49 = vpop.f32.mrb[15].mxu1 }
 0x7a6   : > { %v1471_v51 = vadd.f32 %v1713_v44, %v1470_v49 }
 0x7a7   : > { %v1745_v52 = vpack.c.bf16 %v1479_v48, %v1476_v47 }
 0x7a8   : > { %v1740_v53 = vpack.c.bf16 %v1471_v51, %v1468_v50 }
 0x7a9   : > { %1747 = vst [vmem:[%s408_s26 + $0x8] sm:$0xff] %v1745_v52  }
 0x7aa   : > { %1741 = vst [vmem:[%s408_s26] sm:$0xff] %v1740_v53  }
 0x7ab   : > { %2300 = shalt.err (!%p2297_p13)
}
 0x7ac   : > { %s2301_s15 = scalar_lea.hbm %s2747_s16, 256  ;;  %s2305_s26 = scalar_lea.hbm %s2824_s18, 512 }
 0x7ad   : > { %p2302_p9 = scmp.ne.s32.totalorder %s2747_s16, %s2301_s15  ;;  %p2306_p4 = scmp.lt.u32.totalorder %s2747_s16, %s2824_s18 }
 0x7ae   : > { %p2307_p8 = scmp.lt.u32.totalorder %s2305_s26, %s2301_s15  ;;  %p2309_p3 = scmp.lt.u32.totalorder %s2301_s15, %s2747_s16 }
 0x7af   : > { %p2303_p0 = pnand %p2302_p9, %p2594_p10 }
 0x7b0   : > { %p2308_p6 = por %p2307_p8, %p2306_p4 }
 0x7b1   : > { %p2304_p11 = pneg %p2303_p0 }
 0x7b2   : > { %p2310_p5 = por %p2309_p3, %p2308_p6 }
 0x7b4   : > { %p2311_p7 = pnand %p2310_p5, %p2304_p11 }
 0x7b6   : > { %2314 = shalt.err (!%p2311_p7)
}
 0x7b7   : > { %s2371_s29 = smov 64   ;;  %s2372_s21 = smov 4  }
 0x7b8   : > { %2006 = dma.vmem_to_hbm [thread:$0]  (%p2594_p10), %s2742_s19, 256, %s2747_s16, %s1503_s13, %s2371_s29, %s2371_s29, %s2372_s21  }
 0x7b9 PF: > { %s2825_s23 = sld [smem:[#allocation17_spill]]  ;;  %s2826_s24 = sld [smem:[#allocation18_spill]] }
 0x7ba   : > { %p2828_p1 = scmp.ge.s32.totalorder %s2361_s12, 2 }
 0x7bf   : > { %s1531_s9 = sand.u32 1, %s2825_s23   ;;  %p2827_p12 = scmp.ne.s32.totalorder %s2826_s24, 0 }
 0x7c0   : > { %s1532_s15 = scalar_lea.sflag [#allocation5], %s1531_s9 }
 0x7c1   : > { %p2026_p2 = pnand %p2828_p1, %p2827_p12 }
 0x7c3   : > { %2344 = dma.done.wait (!%p2026_p2), %s1532_s15, 256  }
 0x7c4   : > { %2346 = vsyncadd (!%p2026_p2), %s1532_s15, 4294967040  ;;  %p24_p13 = scmp.ge.s32.totalorder %s2584_s14, 4   ;;  %s2829_s30 = smov %s2353_s10 }
 0x7c5   : > { %s2830_s10 = smov %s2357_s11  ;;  %s2831_s11 = smov %s2600_s28 }
 0x7c6   : > { %s2832_s12 = smov %s2584_s14  ;;  %26 = sbr.rel (!%p24_p13) target bundleno = 9 (0x9), region = 125 }
 0x7cd   :  { %1537 = vsyncpa [#allocation4], 1 }
 0x7ce   :  { %1539 = vsyncpa [#allocation4 + $0x1], 1 }
 0x7cf   :  { %1540 = vsyncpa [#allocation7], 1 }
 0x7d0   :  { %1541 = vsyncpa [#allocation10], 1 }
 0x7d1   :  { %1542 = vsyncpa [#allocation5], 1 }
 0x7d2   :  { %1544 = vsyncpa [#allocation5 + $0x1], 1 }

</bundles_post_ra>
